<compile_context>
chip_gen: v5e
topology: v5e:2x2
jax: 0.10.0
libtpu: 0.0.40
codegen_flags: <defaults>
</compile_context>

<pallas_src>
import math
import functools

import jax
import jax.numpy as jnp
from jax import lax
from jax.experimental import pallas as pl
from jax.experimental.pallas import tpu as pltpu


# ----------------------------- in-kernel helpers -----------------------------

def _layernorm(x, g, b, eps=1e-5):
    mu = jnp.mean(x, axis=-1, keepdims=True)
    var = jnp.mean((x - mu) ** 2, axis=-1, keepdims=True)
    return (x - mu) * lax.rsqrt(var + eps) * g + b


# ------------------------------ encoder layer kernel -------------------------

def _encoder_layer_kernel(x_ref, maskadd_ref, maskmul_ref,
                          wqkv, bqkv, wo, bo,
                          ln1g, ln1b, ln2g, ln2b,
                          c1w, c1b, c2w, c2b,
                          fng, fnb,
                          attns_hbm_ref,            # aliased output buffer, never read
                          xout_ref, attn_ref,
                          *, heads, kernel_size, apply_final_norm):
    del attns_hbm_ref
    x = x_ref[...]                       # (T, D) f32 (batch dim squeezed)
    mask_add = maskadd_ref[...]          # (1, T) additive key mask: 0 valid, -1e9 pad
    mask_mul = maskmul_ref[...]          # (T, 1) multiplicative frame mask: 1 valid, 0 pad
    T, D = x.shape
    dh = D // heads

    # ---- fused QKV projection: one MXU pass, bf16 operands / f32 accumulation.
    # The softmax 1/sqrt(dh) scale is already folded into the Q columns of wqkv.
    xb = x.astype(jnp.bfloat16)
    qkv = jnp.dot(xb, wqkv[...], preferred_element_type=jnp.float32) + bqkv[...]
    q, k, v = qkv[:, :D], qkv[:, D:2 * D], qkv[:, 2 * D:]

    qh = q.reshape(T, heads, dh).astype(jnp.bfloat16)
    kh = k.reshape(T, heads, dh).astype(jnp.bfloat16)
    vh = v.reshape(T, heads, dh).astype(jnp.bfloat16)
    # TODO(synk): at production D, check the lowered MLIR for relayout copies from
    #             these head splits; an (H, T, dh) layout via pltpu.einshape may be cheaper.

    s = jnp.einsum('qhd,khd->hqk', qh, kh,
                   preferred_element_type=jnp.float32)            # (H, T, T)
    s = s + mask_add[None]                                        # (1,1,T) broadcast
    s = s - jnp.max(s, axis=-1, keepdims=True)
    e = jnp.exp(s)
    # Exact reciprocal on the small (H,T,1) denominator: the stored attention maps
    # are consumed downstream, so rows must sum to 1 (within bf16 rounding).
    p = (e * (1.0 / jnp.sum(e, axis=-1, keepdims=True))).astype(jnp.bfloat16)
    attn_ref[...] = p.astype(attn_ref.dtype)      # no-op cast when attn dtype is bf16

    ctx = jnp.einsum('hqk,khd->qhd', p, vh,
                     preferred_element_type=jnp.float32).reshape(T, D)
    mha = jnp.dot(ctx.astype(jnp.bfloat16), wo[...],
                  preferred_element_type=jnp.float32) + bo[...]

    x = _layernorm(x + mha, ln1g[...], ln1b[...])

    # ---- position-wise Conv1d feed-forward ('same' zero padding) as K
    #      accumulated matmuls: no im2col buffer, no lane-dim concatenate.
    pad = (kernel_size - 1) // 2
    row = lax.broadcasted_iota(jnp.int32, (T, 1), 0)

    def conv1d(inp, w_ref, b_ref):                 # inp (T,Cin) f32; w_ref (K,Cin,Cout)
        acc = jnp.dot(inp.astype(jnp.bfloat16), w_ref[pad],
                      preferred_element_type=jnp.float32)          # centre tap (off = 0)
        for j in range(kernel_size):
            off = j - pad
            if off == 0:
                continue
            tap = pltpu.roll(inp, shift=(-off) % T, axis=0)        # tap j reads inp[t+off]
            tap = jnp.where((row + off >= 0) & (row + off < T), tap, 0.0)
            acc = acc + jnp.dot(tap.astype(jnp.bfloat16), w_ref[j],
                                preferred_element_type=jnp.float32)
        return acc + b_ref[...]

    # Zero padded frames before the conv so boundary taps of the last valid frames
    # do not read garbage activations (residual below still uses the unmasked x).
    xc = x * mask_mul
    h1 = jax.nn.relu(conv1d(xc, c1w, c1b))
    ff = conv1d(h1, c2w, c2b)

    x = _layernorm(x + ff, ln2g[...], ln2b[...])
    if apply_final_norm:                 # static flag: encoder-level LN fused here
        x = _layernorm(x, fng[...], fnb[...])
    xout_ref[...] = x


def _full_spec(arr):
    nd = arr.ndim
    return pl.BlockSpec(arr.shape, lambda b, _nd=nd: (0,) * _nd)


def _layer_vmem_limit_bytes(T, D, heads, d_ff, ksize, attn_itemsize):
    """Explicit scoped-VMEM budget derived from the actual block sizes."""
    bf, f32 = 2, 4
    weights = bf * (3 * D * D + D * D + ksize * D * d_ff + ksize * d_ff * D) \
        + f32 * (3 * D + D + 8 * D + d_ff + D)
    io_blocks = f32 * (2 * T * D + 2 * T) + attn_itemsize * heads * T * T
    live = f32 * (2 * heads * T * T + 3 * T * D + 2 * T * d_ff + 8 * T * D) \
        + bf * (heads * T * T + T * max(D, d_ff))
    # x2: default double buffering of blocked operands (single-buffering the
    # constant weights is a production-size TODO), plus fixed headroom.
    est = 2 * (weights + io_blocks) + live + (8 << 20)
    return int(min(max(est, 32 << 20), 64 << 20))


def encoder_layer(x, mask_add, mask_mul, lp, norm_g, norm_b, attns_buf, *,
                  layer_idx, heads, kernel_size, apply_final_norm):
    """x: (B,T,D) f32; mask_add: (B,1,T) f32; mask_mul: (B,T,1) f32;
    attns_buf: (B,N,H,T,T) -- layer `layer_idx` slice is written in place.

    Returns (x_out (B,T,D) f32, attns_buf with layer slice updated)."""
    B, T, D = x.shape
    d_ff = lp["c1b"].shape[-1]
    weights = [lp["wqkv"], lp["bqkv"], lp["wo"], lp["bo"],
               lp["ln1g"], lp["ln1b"], lp["ln2g"], lp["ln2b"],
               lp["c1w"], lp["c1b"], lp["c2w"], lp["c2b"],
               norm_g, norm_b]

    kernel = functools.partial(_encoder_layer_kernel, heads=heads,
                               kernel_size=kernel_size,
                               apply_final_norm=apply_final_norm)

    in_specs = (
        [pl.BlockSpec((None, T, D), lambda b: (b, 0, 0)),
         pl.BlockSpec((None, 1, T), lambda b: (b, 0, 0)),
         pl.BlockSpec((None, T, 1), lambda b: (b, 0, 0))]
        + [_full_spec(w) for w in weights]
        # TODO(synk): at production sizes single-buffer these constant weight
        #             operands (pipeline_mode=pl.Buffered(1) or manual copy).
        + [pl.BlockSpec(memory_space=pl.ANY)]          # aliased attn buffer (HBM)
    )

    out_shape = (jax.ShapeDtypeStruct((B, T, D), jnp.float32),
                 jax.ShapeDtypeStruct(attns_buf.shape, attns_buf.dtype))
    out_specs = (
        pl.BlockSpec((None, T, D), lambda b: (b, 0, 0)),
        pl.BlockSpec((None, None, heads, T, T),
                     lambda b, _i=layer_idx: (b, _i, 0, 0, 0)),
    )

    n_inputs = 3 + len(weights) + 1
    vmem_limit = _layer_vmem_limit_bytes(
        T, D, heads, d_ff, kernel_size, jnp.dtype(attns_buf.dtype).itemsize)

    return pl.pallas_call(
        kernel,
        grid=(B,),
        in_specs=in_specs,
        out_specs=out_specs,
        out_shape=out_shape,
        input_output_aliases={n_inputs - 1: 1},        # attns_buf written in place
        compiler_params=pltpu.CompilerParams(
            dimension_semantics=("parallel",),
            vmem_limit_bytes=vmem_limit),
    )(x, mask_add, mask_mul, *weights, attns_buf)


# ------------------------------ parameter construction ------------------------

def init_params(key, *, vocab_size, d_model, N, heads, d_ff, ksize):
    keys = jax.random.split(key, 1 + N)

    embed = 0.02 * jax.random.normal(keys[0], (vocab_size, d_model), jnp.float32)
    embed = embed.at[0].set(0.0)                      # padding_idx = 0

    dh = d_model // heads
    qscale = 1.0 / math.sqrt(dh)

    def layer_params(k):
        ks = jax.random.split(k, 6)
        dense = lambda kk, shp: 0.02 * jax.random.normal(kk, shp, jnp.float32)
        wq, wk, wv, wo = (dense(ks[i], (d_model, d_model)) for i in range(4))
        bq = bk = bv = bo = jnp.zeros((d_model,), jnp.float32)
        # Fused QKV weight with the softmax 1/sqrt(dh) scale folded into the Q
        # columns (zero in-kernel scaling cost).  In a real port, do this fold
        # when converting the PyTorch state dict.
        wqkv = jnp.concatenate([wq * qscale, wk, wv], axis=1).astype(jnp.bfloat16)
        bqkv = jnp.concatenate([bq * qscale, bk, bv])[None, :]
        # Conv1d weights per tap: PyTorch (Cout, Cin, K) -> (K, Cin, Cout)
        c1w = dense(ks[4], (ksize, d_model, d_ff)).astype(jnp.bfloat16)
        c2w = dense(ks[5], (ksize, d_ff, d_model)).astype(jnp.bfloat16)
        return dict(
            wqkv=wqkv, bqkv=bqkv,
            wo=wo.astype(jnp.bfloat16), bo=bo[None, :],
            ln1g=jnp.ones((1, d_model), jnp.float32), ln1b=jnp.zeros((1, d_model), jnp.float32),
            ln2g=jnp.ones((1, d_model), jnp.float32), ln2b=jnp.zeros((1, d_model), jnp.float32),
            c1w=c1w, c1b=jnp.zeros((1, d_ff), jnp.float32),
            c2w=c2w, c2b=jnp.zeros((1, d_model), jnp.float32),
        )

    layers = [layer_params(keys[1 + i]) for i in range(N)]
    return dict(embed=embed,
                layers=layers,
                norm_g=jnp.ones((1, d_model), jnp.float32),
                norm_b=jnp.zeros((1, d_model), jnp.float32))


def relative_sinusoid_pe(T, D):
    """Relative sinusoidal table over offsets (T-1) .. -(T-1), shape (2T-1, D)."""
    pos = jnp.arange(T - 1, -T, -1, dtype=jnp.float32)[:, None]
    i = jnp.arange(D, dtype=jnp.float32)[None, :]
    angle = pos / jnp.power(10000.0, (2.0 * jnp.floor(i / 2.0)) / D)
    return jnp.where(jnp.arange(D)[None, :] % 2 == 0,
                     jnp.sin(angle), jnp.cos(angle)).astype(jnp.float32)


# ------------------------------ module forward --------------------------------

def conformer_encoder_forward(src, params, *, heads, ksize,
                              attn_dtype=jnp.bfloat16):
    """src: (B, T) int32 token ids.

    Returns (norm(x) (B,T,D) f32, attns_enc (B, N, H, T, T) attn_dtype)."""
    d_model = params["embed"].shape[1]
    B, T = src.shape
    N = len(params["layers"])

    # embedding gather (glue); xscale = 1 per the spec, dropout off (eval mode)
    x = params["embed"][src]                                        # (B, T, D)
    _pe = relative_sinusoid_pe(T, d_model)                          # (2T-1, D)
    # TODO(synk): _pe (relative positional encoding) is not consumed by the
    #             attention kernel -- ConformerEncoderLayer source not provided.

    valid = (src != 0)
    # additive key mask for attention; multiplicative frame mask for the conv FF
    mask_add = jnp.where(valid, 0.0, -1e9).astype(jnp.float32)[:, None, :]
    mask_mul = valid.astype(jnp.float32)[:, :, None]

    # Per-layer attention maps are written in place into this buffer via
    # input_output_aliases (no jnp.stack / extra HBM copy).
    attns = jnp.zeros((B, N, heads, T, T), attn_dtype)
    for i, lp in enumerate(params["layers"]):
        x, attns = encoder_layer(
            x, mask_add, mask_mul, lp, params["norm_g"], params["norm_b"], attns,
            layer_idx=i, heads=heads, kernel_size=ksize,
            apply_final_norm=(i == N - 1))            # final encoder LN fused here
    return x, attns


# ------------------------------ main -------------------------------------------

if __name__ == "__main__":
    # Toy shapes for correctness only; production tuning needs T, D multiples of 128.
    vocab_size, d_model, N, heads, ksize, d_ff = 20, 32, 2, 4, 3, 64
    B, T = 2, 8

    key = jax.random.PRNGKey(0)
    kp, ks = jax.random.split(key)
    params = init_params(kp, vocab_size=vocab_size, d_model=d_model, N=N,
                         heads=heads, d_ff=d_ff, ksize=ksize)

    src = jax.random.randint(ks, (B, T), 1, vocab_size, dtype=jnp.int32)
    src = src.at[1, -2:].set(0)   # padded tail in the second sequence

    x_out, attns = conformer_encoder_forward(src, params, heads=heads, ksize=ksize)
    jax.block_until_ready((x_out, attns))

    assert x_out.shape == (B, T, d_model)
    assert attns.shape == (B, N, heads, T, T)
    assert bool(jnp.isfinite(x_out).all()) and bool(jnp.isfinite(attns.astype(jnp.float32)).all())
    # attention rows sum to ~1 (bf16-stored probabilities => small slack)
    row_sums = attns.astype(jnp.float32).sum(-1)
    assert bool(jnp.allclose(row_sums, 1.0, atol=2e-2))

    print("KERNEL_OK")
</pallas_src>

<mosaic_0001>
module attributes {stable_mosaic.version = 11 : i64} {
  func.func @_encoder_layer_kernel(%arg0: i32, %arg1: memref<1x8x32xf32, #tpu.memory_space<vmem>>, %arg2: memref<1x1x8xf32, #tpu.memory_space<vmem>>, %arg3: memref<1x8x1xf32, #tpu.memory_space<vmem>>, %arg4: memref<32x96xbf16, #tpu.memory_space<vmem>>, %arg5: memref<1x96xf32, #tpu.memory_space<vmem>>, %arg6: memref<32x32xbf16, #tpu.memory_space<vmem>>, %arg7: memref<1x32xf32, #tpu.memory_space<vmem>>, %arg8: memref<1x32xf32, #tpu.memory_space<vmem>>, %arg9: memref<1x32xf32, #tpu.memory_space<vmem>>, %arg10: memref<1x32xf32, #tpu.memory_space<vmem>>, %arg11: memref<1x32xf32, #tpu.memory_space<vmem>>, %arg12: memref<3x32x64xbf16, #tpu.memory_space<vmem>>, %arg13: memref<1x64xf32, #tpu.memory_space<vmem>>, %arg14: memref<3x64x32xbf16, #tpu.memory_space<vmem>>, %arg15: memref<1x32xf32, #tpu.memory_space<vmem>>, %arg16: memref<1x32xf32, #tpu.memory_space<vmem>>, %arg17: memref<1x32xf32, #tpu.memory_space<vmem>>, %arg18: memref<2x2x4x8x8xbf16, #tpu.memory_space<any>>, %arg19: memref<1x8x32xf32, #tpu.memory_space<vmem>>, %arg20: memref<1x1x4x8x8xbf16, #tpu.memory_space<vmem>>) attributes {dimension_semantics = [#tpu.dimension_semantics<parallel>], iteration_bounds = array<i64: 2>, scalar_prefetch = 0 : i64, scratch_operands = 0 : i64, tpu.core_type = #tpu.core_type<tc>, window_params = [{transform_indices = @transform_0, window_bounds = array<i64: 1, 8, 32>}, {transform_indices = @transform_1, window_bounds = array<i64: 1, 1, 8>}, {transform_indices = @transform_2, window_bounds = array<i64: 1, 8, 1>}, {pipeline_mode = #tpu.pipeline_mode<synchronous>, transform_indices = @transform_3, window_bounds = array<i64: 32, 96>}, {pipeline_mode = #tpu.pipeline_mode<synchronous>, transform_indices = @transform_4, window_bounds = array<i64: 1, 96>}, {pipeline_mode = #tpu.pipeline_mode<synchronous>, transform_indices = @transform_5, window_bounds = array<i64: 32, 32>}, {pipeline_mode = #tpu.pipeline_mode<synchronous>, transform_indices = @transform_6, window_bounds = array<i64: 1, 32>}, {pipeline_mode = #tpu.pipeline_mode<synchronous>, transform_indices = @transform_7, window_bounds = array<i64: 1, 32>}, {pipeline_mode = #tpu.pipeline_mode<synchronous>, transform_indices = @transform_8, window_bounds = array<i64: 1, 32>}, {pipeline_mode = #tpu.pipeline_mode<synchronous>, transform_indices = @transform_9, window_bounds = array<i64: 1, 32>}, {pipeline_mode = #tpu.pipeline_mode<synchronous>, transform_indices = @transform_10, window_bounds = array<i64: 1, 32>}, {pipeline_mode = #tpu.pipeline_mode<synchronous>, transform_indices = @transform_11, window_bounds = array<i64: 3, 32, 64>}, {pipeline_mode = #tpu.pipeline_mode<synchronous>, transform_indices = @transform_12, window_bounds = array<i64: 1, 64>}, {pipeline_mode = #tpu.pipeline_mode<synchronous>, transform_indices = @transform_13, window_bounds = array<i64: 3, 64, 32>}, {pipeline_mode = #tpu.pipeline_mode<synchronous>, transform_indices = @transform_14, window_bounds = array<i64: 1, 32>}, {pipeline_mode = #tpu.pipeline_mode<synchronous>, transform_indices = @transform_15, window_bounds = array<i64: 1, 32>}, {pipeline_mode = #tpu.pipeline_mode<synchronous>, transform_indices = @transform_16, window_bounds = array<i64: 1, 32>}, {}, {transform_indices = @transform_18, window_bounds = array<i64: 1, 8, 32>}, {transform_indices = @transform_19, window_bounds = array<i64: 1, 1, 4, 8, 8>}]} {
    %c0 = arith.constant 0 : index
    %c0_0 = arith.constant 0 : index
    %c0_1 = arith.constant 0 : index
    %0 = vector.load %arg1[%c0, %c0_0, %c0_1] : memref<1x8x32xf32, #tpu.memory_space<vmem>>, vector<1x8x32xf32>
    %1 = vector.shape_cast %0 : vector<1x8x32xf32> to vector<8x32xf32>
    %c0_2 = arith.constant 0 : index
    %c0_3 = arith.constant 0 : index
    %c0_4 = arith.constant 0 : index
    %2 = vector.load %arg2[%c0_2, %c0_3, %c0_4] : memref<1x1x8xf32, #tpu.memory_space<vmem>>, vector<1x1x8xf32>
    %3 = vector.shape_cast %2 : vector<1x1x8xf32> to vector<1x8xf32>
    %c0_5 = arith.constant 0 : index
    %c0_6 = arith.constant 0 : index
    %c0_7 = arith.constant 0 : index
    %4 = vector.load %arg3[%c0_5, %c0_6, %c0_7] : memref<1x8x1xf32, #tpu.memory_space<vmem>>, vector<1x8x1xf32>
    %5 = vector.shape_cast %4 : vector<1x8x1xf32> to vector<8x1xf32>
    %6 = arith.truncf %1 : vector<8x32xf32> to vector<8x32xbf16>
    %c0_8 = arith.constant 0 : index
    %c0_9 = arith.constant 0 : index
    %7 = vector.load %arg4[%c0_8, %c0_9] : memref<32x96xbf16, #tpu.memory_space<vmem>>, vector<32x96xbf16>
    %cst = arith.constant dense<0.000000e+00> : vector<8x96xf32>
    %8 = tpu.matmul %6, %7, %cst {dimension_numbers = #tpu.dot_dimension_numbers<[1], [0], [0], [1], [0, 0, 1, 1], [], []>} : vector<8x32xbf16>, vector<32x96xbf16>, vector<8x96xf32> -> vector<8x96xf32>
    %c0_10 = arith.constant 0 : index
    %c0_11 = arith.constant 0 : index
    %9 = vector.load %arg5[%c0_10, %c0_11] : memref<1x96xf32, #tpu.memory_space<vmem>>, vector<1x96xf32>
    %10 = vector.broadcast %9 : vector<1x96xf32> to vector<8x96xf32>
    %11 = arith.addf %8, %10 : vector<8x96xf32>
    %12 = vector.extract_strided_slice %11 {offsets = [0, 0], sizes = [8, 32], strides = [1, 1]} : vector<8x96xf32> to vector<8x32xf32>
    %13 = vector.extract_strided_slice %11 {offsets = [0, 32], sizes = [8, 32], strides = [1, 1]} : vector<8x96xf32> to vector<8x32xf32>
    %14 = vector.extract_strided_slice %11 {offsets = [0, 64], sizes = [8, 32], strides = [1, 1]} : vector<8x96xf32> to vector<8x32xf32>
    %15 = vector.shape_cast %12 : vector<8x32xf32> to vector<8x4x8xf32>
    %16 = arith.truncf %15 : vector<8x4x8xf32> to vector<8x4x8xbf16>
    %17 = vector.shape_cast %13 : vector<8x32xf32> to vector<8x4x8xf32>
    %18 = arith.truncf %17 : vector<8x4x8xf32> to vector<8x4x8xbf16>
    %19 = vector.shape_cast %14 : vector<8x32xf32> to vector<8x4x8xf32>
    %20 = arith.truncf %19 : vector<8x4x8xf32> to vector<8x4x8xbf16>
    "tpu.trace_start"() <{level = 10 : i32, message = "qhd,khd->hqk"}> : () -> ()
    %cst_12 = arith.constant dense<0.000000e+00> : vector<4x8x8xf32>
    %21 = tpu.matmul %16, %18, %cst_12 {dimension_numbers = #tpu.dot_dimension_numbers<[2], [2], [0], [0], [0, 1, 0, 0, 1, 0], [1], [1]>} : vector<8x4x8xbf16>, vector<8x4x8xbf16>, vector<4x8x8xf32> -> vector<4x8x8xf32>
    "tpu.trace_stop"() : () -> ()
    %22 = vector.shape_cast %3 : vector<1x8xf32> to vector<1x1x8xf32>
    %23 = vector.broadcast %22 : vector<1x1x8xf32> to vector<4x8x8xf32>
    %24 = arith.addf %21, %23 : vector<4x8x8xf32>
    %cst_13 = arith.constant dense<0xFF800000> : vector<4x8xf32>
    %25 = vector.multi_reduction <maximumf>, %24, %cst_13 [2] : vector<4x8x8xf32> to vector<4x8xf32>
    %26 = vector.shape_cast %25 : vector<4x8xf32> to vector<4x8x1xf32>
    %27 = vector.broadcast %26 : vector<4x8x1xf32> to vector<4x8x8xf32>
    %28 = arith.subf %24, %27 : vector<4x8x8xf32>
    %29 = math.exp %28 : vector<4x8x8xf32>
    %cst_14 = arith.constant dense<0.000000e+00> : vector<4x8xf32>
    %30 = vector.multi_reduction <add>, %29, %cst_14 [2] : vector<4x8x8xf32> to vector<4x8xf32>
    %31 = vector.shape_cast %30 : vector<4x8xf32> to vector<4x8x1xf32>
    %cst_15 = arith.constant 1.000000e+00 : f32
    %32 = vector.broadcast %cst_15 : f32 to vector<4x8x1xf32>
    %33 = arith.divf %32, %31 : vector<4x8x1xf32>
    %34 = vector.broadcast %33 : vector<4x8x1xf32> to vector<4x8x8xf32>
    %35 = arith.mulf %29, %34 : vector<4x8x8xf32>
    %36 = arith.truncf %35 : vector<4x8x8xf32> to vector<4x8x8xbf16>
    %c0_16 = arith.constant 0 : index
    %c0_17 = arith.constant 0 : index
    %c0_18 = arith.constant 0 : index
    %c0_19 = arith.constant 0 : index
    %c0_20 = arith.constant 0 : index
    %37 = vector.load %arg20[%c0_16, %c0_17, %c0_18, %c0_19, %c0_20] : memref<1x1x4x8x8xbf16, #tpu.memory_space<vmem>>, vector<1x1x4x8x8xbf16>
    %38 = vector.shape_cast %37 : vector<1x1x4x8x8xbf16> to vector<4x8x8xbf16>
    %39 = vector.shape_cast %36 : vector<4x8x8xbf16> to vector<1x1x4x8x8xbf16>
    tpu.vector_store %arg20[%c0_16, %c0_17, %c0_18, %c0_19, %c0_20], %39 {strides = array<i32>} : memref<1x1x4x8x8xbf16, #tpu.memory_space<vmem>>, vector<1x1x4x8x8xbf16>,
    "tpu.trace_start"() <{level = 10 : i32, message = "hqk,khd->qhd"}> : () -> ()
    %cst_21 = arith.constant dense<0.000000e+00> : vector<4x8x8xf32>
    %40 = tpu.matmul %20, %36, %cst_21 {dimension_numbers = #tpu.dot_dimension_numbers<[0], [2], [2], [1], [0, 1, 0, 2, 1, 1], [1], [0]>} : vector<8x4x8xbf16>, vector<4x8x8xbf16>, vector<4x8x8xf32> -> vector<4x8x8xf32>
    %41 = tpu.transpose %40, [2, 0, 1] : vector<4x8x8xf32> -> vector<8x4x8xf32>
    "tpu.trace_stop"() : () -> ()
    %42 = vector.shape_cast %41 : vector<8x4x8xf32> to vector<8x32xf32>
    %43 = arith.truncf %42 : vector<8x32xf32> to vector<8x32xbf16>
    %c0_22 = arith.constant 0 : index
    %c0_23 = arith.constant 0 : index
    %44 = vector.load %arg6[%c0_22, %c0_23] : memref<32x32xbf16, #tpu.memory_space<vmem>>, vector<32x32xbf16>
    %cst_24 = arith.constant dense<0.000000e+00> : vector<8x32xf32>
    %45 = tpu.matmul %43, %44, %cst_24 {dimension_numbers = #tpu.dot_dimension_numbers<[1], [0], [0], [1], [0, 0, 1, 1], [], []>} : vector<8x32xbf16>, vector<32x32xbf16>, vector<8x32xf32> -> vector<8x32xf32>
    %c0_25 = arith.constant 0 : index
    %c0_26 = arith.constant 0 : index
    %46 = vector.load %arg7[%c0_25, %c0_26] : memref<1x32xf32, #tpu.memory_space<vmem>>, vector<1x32xf32>
    %47 = vector.broadcast %46 : vector<1x32xf32> to vector<8x32xf32>
    %48 = arith.addf %45, %47 : vector<8x32xf32>
    %49 = arith.addf %1, %48 : vector<8x32xf32>
    %c0_27 = arith.constant 0 : index
    %c0_28 = arith.constant 0 : index
    %50 = vector.load %arg8[%c0_27, %c0_28] : memref<1x32xf32, #tpu.memory_space<vmem>>, vector<1x32xf32>
    %c0_29 = arith.constant 0 : index
    %c0_30 = arith.constant 0 : index
    %51 = vector.load %arg9[%c0_29, %c0_30] : memref<1x32xf32, #tpu.memory_space<vmem>>, vector<1x32xf32>
    %cst_31 = arith.constant dense<0.000000e+00> : vector<8xf32>
    %52 = vector.multi_reduction <add>, %49, %cst_31 [1] : vector<8x32xf32> to vector<8xf32>
    %53 = vector.shape_cast %52 : vector<8xf32> to vector<8x1xf32>
    %cst_32 = arith.constant 3.200000e+01 : f32
    %54 = vector.broadcast %cst_32 : f32 to vector<8x1xf32>
    %55 = arith.divf %53, %54 : vector<8x1xf32>
    %56 = vector.broadcast %55 : vector<8x1xf32> to vector<8x32xf32>
    %57 = arith.subf %49, %56 : vector<8x32xf32>
    %58 = arith.mulf %57, %57 : vector<8x32xf32>
    %cst_33 = arith.constant dense<0.000000e+00> : vector<8xf32>
    %59 = vector.multi_reduction <add>, %58, %cst_33 [1] : vector<8x32xf32> to vector<8xf32>
    %60 = vector.shape_cast %59 : vector<8xf32> to vector<8x1xf32>
    %cst_34 = arith.constant 3.200000e+01 : f32
    %61 = vector.broadcast %cst_34 : f32 to vector<8x1xf32>
    %62 = arith.divf %60, %61 : vector<8x1xf32>
    %63 = vector.broadcast %55 : vector<8x1xf32> to vector<8x32xf32>
    %64 = arith.subf %49, %63 : vector<8x32xf32>
    %cst_35 = arith.constant 9.99999974E-6 : f32
    %65 = vector.broadcast %cst_35 : f32 to vector<8x1xf32>
    %66 = arith.addf %62, %65 : vector<8x1xf32>
    %67 = math.rsqrt %66 : vector<8x1xf32>
    %68 = vector.broadcast %67 : vector<8x1xf32> to vector<8x32xf32>
    %69 = arith.mulf %64, %68 : vector<8x32xf32>
    %70 = vector.broadcast %50 : vector<1x32xf32> to vector<8x32xf32>
    %71 = arith.mulf %69, %70 : vector<8x32xf32>
    %72 = vector.broadcast %51 : vector<1x32xf32> to vector<8x32xf32>
    %73 = arith.addf %71, %72 : vector<8x32xf32>
    %74 = tpu.iota {dimensions = array<i32: 0>} : vector<8x1xi32>
    %75 = vector.broadcast %5 : vector<8x1xf32> to vector<8x32xf32>
    %76 = arith.mulf %73, %75 : vector<8x32xf32>
    %77 = arith.truncf %76 : vector<8x32xf32> to vector<8x32xbf16>
    %c1 = arith.constant 1 : index
    %c0_36 = arith.constant 0 : index
    %c0_37 = arith.constant 0 : index
    %78 = vector.load %arg12[%c1, %c0_36, %c0_37] : memref<3x32x64xbf16, #tpu.memory_space<vmem>>, vector<1x32x64xbf16>
    %79 = vector.shape_cast %78 : vector<1x32x64xbf16> to vector<32x64xbf16>
    %cst_38 = arith.constant dense<0.000000e+00> : vector<8x64xf32>
    %80 = tpu.matmul %77, %79, %cst_38 {dimension_numbers = #tpu.dot_dimension_numbers<[1], [0], [0], [1], [0, 0, 1, 1], [], []>} : vector<8x32xbf16>, vector<32x64xbf16>, vector<8x64xf32> -> vector<8x64xf32>
    %c1_i32 = arith.constant 1 : i32
    %81 = tpu.dynamic_rotate %76 by %c1_i32 dim 0 : vector<8x32xf32>, i32 -> vector<8x32xf32>
    %c-1_i32 = arith.constant -1 : i32
    %82 = vector.broadcast %c-1_i32 : i32 to vector<8x1xi32>
    %83 = arith.addi %74, %82 : vector<8x1xi32>
    %c0_i32 = arith.constant 0 : i32
    %84 = vector.broadcast %c0_i32 : i32 to vector<8x1xi32>
    %85 = arith.cmpi sge, %83, %84 : vector<8x1xi32>
    %c-1_i32_39 = arith.constant -1 : i32
    %86 = vector.broadcast %c-1_i32_39 : i32 to vector<8x1xi32>
    %87 = arith.addi %74, %86 : vector<8x1xi32>
    %c8_i32 = arith.constant 8 : i32
    %88 = vector.broadcast %c8_i32 : i32 to vector<8x1xi32>
    %89 = arith.cmpi slt, %87, %88 : vector<8x1xi32>
    %90 = arith.andi %85, %89 : vector<8x1xi1>
    %cst_40 = arith.constant 0.000000e+00 : f32
    %91 = vector.shape_cast %90 : vector<8x1xi1> to vector<8x1xi1>
    %92 = vector.broadcast %91 : vector<8x1xi1> to vector<8x32xi1>
    %93 = vector.broadcast %cst_40 : f32 to vector<8x32xf32>
    %94 = arith.select %92, %81, %93 : vector<8x32xi1>, vector<8x32xf32>
    %95 = arith.truncf %94 : vector<8x32xf32> to vector<8x32xbf16>
    %c0_41 = arith.constant 0 : index
    %c0_42 = arith.constant 0 : index
    %c0_43 = arith.constant 0 : index
    %96 = vector.load %arg12[%c0_41, %c0_42, %c0_43] : memref<3x32x64xbf16, #tpu.memory_space<vmem>>, vector<1x32x64xbf16>
    %97 = vector.shape_cast %96 : vector<1x32x64xbf16> to vector<32x64xbf16>
    %cst_44 = arith.constant dense<0.000000e+00> : vector<8x64xf32>
    %98 = tpu.matmul %95, %97, %cst_44 {dimension_numbers = #tpu.dot_dimension_numbers<[1], [0], [0], [1], [0, 0, 1, 1], [], []>} : vector<8x32xbf16>, vector<32x64xbf16>, vector<8x64xf32> -> vector<8x64xf32>
    %99 = arith.addf %80, %98 : vector<8x64xf32>
    %c7_i32 = arith.constant 7 : i32
    %100 = tpu.dynamic_rotate %76 by %c7_i32 dim 0 : vector<8x32xf32>, i32 -> vector<8x32xf32>
    %c1_i32_45 = arith.constant 1 : i32
    %101 = vector.broadcast %c1_i32_45 : i32 to vector<8x1xi32>
    %102 = arith.addi %74, %101 : vector<8x1xi32>
    %c0_i32_46 = arith.constant 0 : i32
    %103 = vector.broadcast %c0_i32_46 : i32 to vector<8x1xi32>
    %104 = arith.cmpi sge, %102, %103 : vector<8x1xi32>
    %c1_i32_47 = arith.constant 1 : i32
    %105 = vector.broadcast %c1_i32_47 : i32 to vector<8x1xi32>
    %106 = arith.addi %74, %105 : vector<8x1xi32>
    %c8_i32_48 = arith.constant 8 : i32
    %107 = vector.broadcast %c8_i32_48 : i32 to vector<8x1xi32>
    %108 = arith.cmpi slt, %106, %107 : vector<8x1xi32>
    %109 = arith.andi %104, %108 : vector<8x1xi1>
    %cst_49 = arith.constant 0.000000e+00 : f32
    %110 = vector.shape_cast %109 : vector<8x1xi1> to vector<8x1xi1>
    %111 = vector.broadcast %110 : vector<8x1xi1> to vector<8x32xi1>
    %112 = vector.broadcast %cst_49 : f32 to vector<8x32xf32>
    %113 = arith.select %111, %100, %112 : vector<8x32xi1>, vector<8x32xf32>
    %114 = arith.truncf %113 : vector<8x32xf32> to vector<8x32xbf16>
    %c2 = arith.constant 2 : index
    %c0_50 = arith.constant 0 : index
    %c0_51 = arith.constant 0 : index
    %115 = vector.load %arg12[%c2, %c0_50, %c0_51] : memref<3x32x64xbf16, #tpu.memory_space<vmem>>, vector<1x32x64xbf16>
    %116 = vector.shape_cast %115 : vector<1x32x64xbf16> to vector<32x64xbf16>
    %cst_52 = arith.constant dense<0.000000e+00> : vector<8x64xf32>
    %117 = tpu.matmul %114, %116, %cst_52 {dimension_numbers = #tpu.dot_dimension_numbers<[1], [0], [0], [1], [0, 0, 1, 1], [], []>} : vector<8x32xbf16>, vector<32x64xbf16>, vector<8x64xf32> -> vector<8x64xf32>
    %118 = arith.addf %99, %117 : vector<8x64xf32>
    %c0_53 = arith.constant 0 : index
    %c0_54 = arith.constant 0 : index
    %119 = vector.load %arg13[%c0_53, %c0_54] : memref<1x64xf32, #tpu.memory_space<vmem>>, vector<1x64xf32>
    %120 = vector.broadcast %119 : vector<1x64xf32> to vector<8x64xf32>
    %121 = arith.addf %118, %120 : vector<8x64xf32>
    %cst_55 = arith.constant 0.000000e+00 : f32
    %122 = vector.broadcast %cst_55 : f32 to vector<8x64xf32>
    %123 = arith.maximumf %121, %122 : vector<8x64xf32>
    %124 = arith.truncf %123 : vector<8x64xf32> to vector<8x64xbf16>
    %c1_56 = arith.constant 1 : index
    %c0_57 = arith.constant 0 : index
    %c0_58 = arith.constant 0 : index
    %125 = vector.load %arg14[%c1_56, %c0_57, %c0_58] : memref<3x64x32xbf16, #tpu.memory_space<vmem>>, vector<1x64x32xbf16>
    %126 = vector.shape_cast %125 : vector<1x64x32xbf16> to vector<64x32xbf16>
    %cst_59 = arith.constant dense<0.000000e+00> : vector<8x32xf32>
    %127 = tpu.matmul %124, %126, %cst_59 {dimension_numbers = #tpu.dot_dimension_numbers<[1], [0], [0], [1], [0, 0, 1, 1], [], []>} : vector<8x64xbf16>, vector<64x32xbf16>, vector<8x32xf32> -> vector<8x32xf32>
    %c1_i32_60 = arith.constant 1 : i32
    %128 = tpu.dynamic_rotate %123 by %c1_i32_60 dim 0 : vector<8x64xf32>, i32 -> vector<8x64xf32>
    %c-1_i32_61 = arith.constant -1 : i32
    %129 = vector.broadcast %c-1_i32_61 : i32 to vector<8x1xi32>
    %130 = arith.addi %74, %129 : vector<8x1xi32>
    %c0_i32_62 = arith.constant 0 : i32
    %131 = vector.broadcast %c0_i32_62 : i32 to vector<8x1xi32>
    %132 = arith.cmpi sge, %130, %131 : vector<8x1xi32>
    %c-1_i32_63 = arith.constant -1 : i32
    %133 = vector.broadcast %c-1_i32_63 : i32 to vector<8x1xi32>
    %134 = arith.addi %74, %133 : vector<8x1xi32>
    %c8_i32_64 = arith.constant 8 : i32
    %135 = vector.broadcast %c8_i32_64 : i32 to vector<8x1xi32>
    %136 = arith.cmpi slt, %134, %135 : vector<8x1xi32>
    %137 = arith.andi %132, %136 : vector<8x1xi1>
    %cst_65 = arith.constant 0.000000e+00 : f32
    %138 = vector.shape_cast %137 : vector<8x1xi1> to vector<8x1xi1>
    %139 = vector.broadcast %138 : vector<8x1xi1> to vector<8x64xi1>
    %140 = vector.broadcast %cst_65 : f32 to vector<8x64xf32>
    %141 = arith.select %139, %128, %140 : vector<8x64xi1>, vector<8x64xf32>
    %142 = arith.truncf %141 : vector<8x64xf32> to vector<8x64xbf16>
    %c0_66 = arith.constant 0 : index
    %c0_67 = arith.constant 0 : index
    %c0_68 = arith.constant 0 : index
    %143 = vector.load %arg14[%c0_66, %c0_67, %c0_68] : memref<3x64x32xbf16, #tpu.memory_space<vmem>>, vector<1x64x32xbf16>
    %144 = vector.shape_cast %143 : vector<1x64x32xbf16> to vector<64x32xbf16>
    %cst_69 = arith.constant dense<0.000000e+00> : vector<8x32xf32>
    %145 = tpu.matmul %142, %144, %cst_69 {dimension_numbers = #tpu.dot_dimension_numbers<[1], [0], [0], [1], [0, 0, 1, 1], [], []>} : vector<8x64xbf16>, vector<64x32xbf16>, vector<8x32xf32> -> vector<8x32xf32>
    %146 = arith.addf %127, %145 : vector<8x32xf32>
    %c7_i32_70 = arith.constant 7 : i32
    %147 = tpu.dynamic_rotate %123 by %c7_i32_70 dim 0 : vector<8x64xf32>, i32 -> vector<8x64xf32>
    %c1_i32_71 = arith.constant 1 : i32
    %148 = vector.broadcast %c1_i32_71 : i32 to vector<8x1xi32>
    %149 = arith.addi %74, %148 : vector<8x1xi32>
    %c0_i32_72 = arith.constant 0 : i32
    %150 = vector.broadcast %c0_i32_72 : i32 to vector<8x1xi32>
    %151 = arith.cmpi sge, %149, %150 : vector<8x1xi32>
    %c1_i32_73 = arith.constant 1 : i32
    %152 = vector.broadcast %c1_i32_73 : i32 to vector<8x1xi32>
    %153 = arith.addi %74, %152 : vector<8x1xi32>
    %c8_i32_74 = arith.constant 8 : i32
    %154 = vector.broadcast %c8_i32_74 : i32 to vector<8x1xi32>
    %155 = arith.cmpi slt, %153, %154 : vector<8x1xi32>
    %156 = arith.andi %151, %155 : vector<8x1xi1>
    %cst_75 = arith.constant 0.000000e+00 : f32
    %157 = vector.shape_cast %156 : vector<8x1xi1> to vector<8x1xi1>
    %158 = vector.broadcast %157 : vector<8x1xi1> to vector<8x64xi1>
    %159 = vector.broadcast %cst_75 : f32 to vector<8x64xf32>
    %160 = arith.select %158, %147, %159 : vector<8x64xi1>, vector<8x64xf32>
    %161 = arith.truncf %160 : vector<8x64xf32> to vector<8x64xbf16>
    %c2_76 = arith.constant 2 : index
    %c0_77 = arith.constant 0 : index
    %c0_78 = arith.constant 0 : index
    %162 = vector.load %arg14[%c2_76, %c0_77, %c0_78] : memref<3x64x32xbf16, #tpu.memory_space<vmem>>, vector<1x64x32xbf16>
    %163 = vector.shape_cast %162 : vector<1x64x32xbf16> to vector<64x32xbf16>
    %cst_79 = arith.constant dense<0.000000e+00> : vector<8x32xf32>
    %164 = tpu.matmul %161, %163, %cst_79 {dimension_numbers = #tpu.dot_dimension_numbers<[1], [0], [0], [1], [0, 0, 1, 1], [], []>} : vector<8x64xbf16>, vector<64x32xbf16>, vector<8x32xf32> -> vector<8x32xf32>
    %165 = arith.addf %146, %164 : vector<8x32xf32>
    %c0_80 = arith.constant 0 : index
    %c0_81 = arith.constant 0 : index
    %166 = vector.load %arg15[%c0_80, %c0_81] : memref<1x32xf32, #tpu.memory_space<vmem>>, vector<1x32xf32>
    %167 = vector.broadcast %166 : vector<1x32xf32> to vector<8x32xf32>
    %168 = arith.addf %165, %167 : vector<8x32xf32>
    %169 = arith.addf %73, %168 : vector<8x32xf32>
    %c0_82 = arith.constant 0 : index
    %c0_83 = arith.constant 0 : index
    %170 = vector.load %arg10[%c0_82, %c0_83] : memref<1x32xf32, #tpu.memory_space<vmem>>, vector<1x32xf32>
    %c0_84 = arith.constant 0 : index
    %c0_85 = arith.constant 0 : index
    %171 = vector.load %arg11[%c0_84, %c0_85] : memref<1x32xf32, #tpu.memory_space<vmem>>, vector<1x32xf32>
    %cst_86 = arith.constant dense<0.000000e+00> : vector<8xf32>
    %172 = vector.multi_reduction <add>, %169, %cst_86 [1] : vector<8x32xf32> to vector<8xf32>
    %173 = vector.shape_cast %172 : vector<8xf32> to vector<8x1xf32>
    %cst_87 = arith.constant 3.200000e+01 : f32
    %174 = vector.broadcast %cst_87 : f32 to vector<8x1xf32>
    %175 = arith.divf %173, %174 : vector<8x1xf32>
    %176 = vector.broadcast %175 : vector<8x1xf32> to vector<8x32xf32>
    %177 = arith.subf %169, %176 : vector<8x32xf32>
    %178 = arith.mulf %177, %177 : vector<8x32xf32>
    %cst_88 = arith.constant dense<0.000000e+00> : vector<8xf32>
    %179 = vector.multi_reduction <add>, %178, %cst_88 [1] : vector<8x32xf32> to vector<8xf32>
    %180 = vector.shape_cast %179 : vector<8xf32> to vector<8x1xf32>
    %cst_89 = arith.constant 3.200000e+01 : f32
    %181 = vector.broadcast %cst_89 : f32 to vector<8x1xf32>
    %182 = arith.divf %180, %181 : vector<8x1xf32>
    %183 = vector.broadcast %175 : vector<8x1xf32> to vector<8x32xf32>
    %184 = arith.subf %169, %183 : vector<8x32xf32>
    %cst_90 = arith.constant 9.99999974E-6 : f32
    %185 = vector.broadcast %cst_90 : f32 to vector<8x1xf32>
    %186 = arith.addf %182, %185 : vector<8x1xf32>
    %187 = math.rsqrt %186 : vector<8x1xf32>
    %188 = vector.broadcast %187 : vector<8x1xf32> to vector<8x32xf32>
    %189 = arith.mulf %184, %188 : vector<8x32xf32>
    %190 = vector.broadcast %170 : vector<1x32xf32> to vector<8x32xf32>
    %191 = arith.mulf %189, %190 : vector<8x32xf32>
    %192 = vector.broadcast %171 : vector<1x32xf32> to vector<8x32xf32>
    %193 = arith.addf %191, %192 : vector<8x32xf32>
    %c0_91 = arith.constant 0 : index
    %c0_92 = arith.constant 0 : index
    %c0_93 = arith.constant 0 : index
    %194 = vector.load %arg19[%c0_91, %c0_92, %c0_93] : memref<1x8x32xf32, #tpu.memory_space<vmem>>, vector<1x8x32xf32>
    %195 = vector.shape_cast %194 : vector<1x8x32xf32> to vector<8x32xf32>
    %196 = vector.shape_cast %193 : vector<8x32xf32> to vector<1x8x32xf32>
    tpu.vector_store %arg19[%c0_91, %c0_92, %c0_93], %196 {strides = array<i32>} : memref<1x8x32xf32, #tpu.memory_space<vmem>>, vector<1x8x32xf32>,
    return
  }
  func.func @transform_0(%arg0: i32) -> (i32, i32, i32) {
    %c0_i32 = arith.constant 0 : i32
    %c0_i32_0 = arith.constant 0 : i32
    %c0_i32_1 = arith.constant 0 : i32
    return %arg0, %c0_i32, %c0_i32_0 : i32, i32, i32
  }
  func.func @transform_1(%arg0: i32) -> (i32, i32, i32) {
    %c0_i32 = arith.constant 0 : i32
    %c0_i32_0 = arith.constant 0 : i32
    %c0_i32_1 = arith.constant 0 : i32
    return %arg0, %c0_i32, %c0_i32_0 : i32, i32, i32
  }
  func.func @transform_2(%arg0: i32) -> (i32, i32, i32) {
    %c0_i32 = arith.constant 0 : i32
    %c0_i32_0 = arith.constant 0 : i32
    %c0_i32_1 = arith.constant 0 : i32
    return %arg0, %c0_i32, %c0_i32_0 : i32, i32, i32
  }
  func.func @transform_3(%arg0: i32) -> (i32, i32) {
    %c0_i32 = arith.constant 0 : i32
    %c0_i32_0 = arith.constant 0 : i32
    %c0_i32_1 = arith.constant 0 : i32
    return %c0_i32, %c0_i32_0 : i32, i32
  }
  func.func @transform_4(%arg0: i32) -> (i32, i32) {
    %c0_i32 = arith.constant 0 : i32
    %c0_i32_0 = arith.constant 0 : i32
    %c0_i32_1 = arith.constant 0 : i32
    return %c0_i32, %c0_i32_0 : i32, i32
  }
  func.func @transform_5(%arg0: i32) -> (i32, i32) {
    %c0_i32 = arith.constant 0 : i32
    %c0_i32_0 = arith.constant 0 : i32
    %c0_i32_1 = arith.constant 0 : i32
    return %c0_i32, %c0_i32_0 : i32, i32
  }
  func.func @transform_6(%arg0: i32) -> (i32, i32) {
    %c0_i32 = arith.constant 0 : i32
    %c0_i32_0 = arith.constant 0 : i32
    %c0_i32_1 = arith.constant 0 : i32
    return %c0_i32, %c0_i32_0 : i32, i32
  }
  func.func @transform_7(%arg0: i32) -> (i32, i32) {
    %c0_i32 = arith.constant 0 : i32
    %c0_i32_0 = arith.constant 0 : i32
    %c0_i32_1 = arith.constant 0 : i32
    return %c0_i32, %c0_i32_0 : i32, i32
  }
  func.func @transform_8(%arg0: i32) -> (i32, i32) {
    %c0_i32 = arith.constant 0 : i32
    %c0_i32_0 = arith.constant 0 : i32
    %c0_i32_1 = arith.constant 0 : i32
    return %c0_i32, %c0_i32_0 : i32, i32
  }
  func.func @transform_9(%arg0: i32) -> (i32, i32) {
    %c0_i32 = arith.constant 0 : i32
    %c0_i32_0 = arith.constant 0 : i32
    %c0_i32_1 = arith.constant 0 : i32
    return %c0_i32, %c0_i32_0 : i32, i32
  }
  func.func @transform_10(%arg0: i32) -> (i32, i32) {
    %c0_i32 = arith.constant 0 : i32
    %c0_i32_0 = arith.constant 0 : i32
    %c0_i32_1 = arith.constant 0 : i32
    return %c0_i32, %c0_i32_0 : i32, i32
  }
  func.func @transform_11(%arg0: i32) -> (i32, i32, i32) {
    %c0_i32 = arith.constant 0 : i32
    %c0_i32_0 = arith.constant 0 : i32
    %c0_i32_1 = arith.constant 0 : i32
    %c0_i32_2 = arith.constant 0 : i32
    return %c0_i32, %c0_i32_0, %c0_i32_1 : i32, i32, i32
  }
  func.func @transform_12(%arg0: i32) -> (i32, i32) {
    %c0_i32 = arith.constant 0 : i32
    %c0_i32_0 = arith.constant 0 : i32
    %c0_i32_1 = arith.constant 0 : i32
    return %c0_i32, %c0_i32_0 : i32, i32
  }
  func.func @transform_13(%arg0: i32) -> (i32, i32, i32) {
    %c0_i32 = arith.constant 0 : i32
    %c0_i32_0 = arith.constant 0 : i32
    %c0_i32_1 = arith.constant 0 : i32
    %c0_i32_2 = arith.constant 0 : i32
    return %c0_i32, %c0_i32_0, %c0_i32_1 : i32, i32, i32
  }
  func.func @transform_14(%arg0: i32) -> (i32, i32) {
    %c0_i32 = arith.constant 0 : i32
    %c0_i32_0 = arith.constant 0 : i32
    %c0_i32_1 = arith.constant 0 : i32
    return %c0_i32, %c0_i32_0 : i32, i32
  }
  func.func @transform_15(%arg0: i32) -> (i32, i32) {
    %c0_i32 = arith.constant 0 : i32
    %c0_i32_0 = arith.constant 0 : i32
    %c0_i32_1 = arith.constant 0 : i32
    return %c0_i32, %c0_i32_0 : i32, i32
  }
  func.func @transform_16(%arg0: i32) -> (i32, i32) {
    %c0_i32 = arith.constant 0 : i32
    %c0_i32_0 = arith.constant 0 : i32
    %c0_i32_1 = arith.constant 0 : i32
    return %c0_i32, %c0_i32_0 : i32, i32
  }
  func.func @transform_18(%arg0: i32) -> (i32, i32, i32) {
    %c0_i32 = arith.constant 0 : i32
    %c0_i32_0 = arith.constant 0 : i32
    %c0_i32_1 = arith.constant 0 : i32
    return %arg0, %c0_i32, %c0_i32_0 : i32, i32, i32
  }
  func.func @transform_19(%arg0: i32) -> (i32, i32, i32, i32, i32) {
    %c0_i32 = arith.constant 0 : i32
    %c0_i32_0 = arith.constant 0 : i32
    %c0_i32_1 = arith.constant 0 : i32
    %c0_i32_2 = arith.constant 0 : i32
    %c0_i32_3 = arith.constant 0 : i32
    return %arg0, %c0_i32, %c0_i32_0, %c0_i32_1, %c0_i32_2 : i32, i32, i32, i32, i32
  }
}

</mosaic_0001>

<bundles_post_ra>
// kernel: tpu_custom_call.1
= control target key start
LH: loop header
LB: loop body
LE: loop exit
PB: predicated region body
PF: predicated region fallthrough
CT: control target
= control target key end

     0   :  { %s3885_s0 = inlined_call_operand.vmem [shape: f32[2,8,32], index: 0, kind: input, shape index: {}]   ;;  %s3886_s1 = inlined_call_operand.vmem [shape: f32[2,1,8], index: 1, kind: input, shape index: {}]   ;;  %s3887_s2 = inlined_call_operand.vmem [shape: f32[2,8,1], index: 2, kind: input, shape index: {}]   ;;  %s3888_s3 = inlined_call_operand.vmem [shape: bf16[32,96], index: 3, kind: input, shape index: {}]   ;;  %s3889_s4 = inlined_call_operand.vmem [shape: f32[1,96], index: 4, kind: input, shape index: {}]   ;;  %s3890_s5 = inlined_call_operand.vmem [shape: bf16[32,32], index: 5, kind: input, shape index: {}]   ;;  %s3891_s6 = inlined_call_operand.vmem [shape: f32[1,32], index: 6, kind: input, shape index: {}]   ;;  %s3892_s7 = inlined_call_operand.vmem [shape: f32[1,32], index: 7, kind: input, shape index: {}]   ;;  %s3893_s8 = inlined_call_operand.vmem [shape: f32[1,32], index: 8, kind: input, shape index: {}]   ;;  %s3894_s9 = inlined_call_operand.vmem [shape: f32[1,32], index: 9, kind: input, shape index: {}]   ;;  %s3895_s10 = inlined_call_operand.vmem [shape: f32[1,32], index: 10, kind: input, shape index: {}]   ;;  %s3896_s11 = inlined_call_operand.vmem [shape: bf16[3,32,64], index: 11, kind: input, shape index: {}]   ;;  %s3897_s12 = inlined_call_operand.vmem [shape: f32[1,64], index: 12, kind: input, shape index: {}]   ;;  %s3898_s13 = inlined_call_operand.vmem [shape: bf16[3,64,32], index: 13, kind: input, shape index: {}]   ;;  %s3899_s14 = inlined_call_operand.vmem [shape: f32[1,32], index: 14, kind: input, shape index: {}]   ;;  %s3900_s15 = inlined_call_operand.vmem [shape: f32[1,32], index: 15, kind: input, shape index: {}]   ;;  %s3901_s16 = inlined_call_operand.vmem [shape: f32[1,32], index: 16, kind: input, shape index: {}]   ;;  %s3902_s17 = inlined_call_operand.hbm [shape: bf16[2,2,4,8,8], index: 17, kind: input, shape index: {}, may-alias: {17,19}]   ;;  %s3903_s18 = inlined_call_operand.hbm [shape: f32[2,8,32], index: 18, kind: output, shape index: {0}]   ;;  %s3904_s19 = inlined_call_operand.hbm [shape: bf16[2,2,4,8,8], index: 19, kind: output, shape index: {1}, may-alias: {17,19}]  }
   0x1   :  { %3911 = sst [smem:[#allocation10_spill]] %s3885_s0 }
   0x2   :  { %3912 = sst [smem:[#allocation11_spill]] %s3886_s1 }
   0x3   :  { %3913 = sst [smem:[#allocation12_spill]] %s3887_s2 }
   0x4   :  { %3914 = sst [smem:[#allocation13_spill]] %s3888_s3 }
   0x5   :  { %3915 = sst [smem:[#allocation14_spill]] %s3889_s4 }
   0x6   :  { %3916 = sst [smem:[#allocation15_spill]] %s3890_s5 }
   0x7   :  { %3917 = sst [smem:[#allocation16_spill]] %s3891_s6 }
   0x8   :  { %3918 = sst [smem:[#allocation17_spill]] %s3892_s7 }
   0x9   :  { %3919 = sst [smem:[#allocation18_spill]] %s3893_s8 }
   0xa   :  { %25 = vsyncpa [#allocation3], 0 }
   0xb   :  { %27 = vsyncpa [#allocation3 + $0x1], 0 }
   0xc   :  { %28 = vsyncpa [#allocation5], 0 }
   0xd   :  { %30 = vsyncpa [#allocation5 + $0x1], 0  ;;  %s3351_s0 = smov 0   ;;  %s3353_s30 = smov 0  }
   0xe   :  { %s3355_s15 = smov 0   ;;  %s3357_s16 = smov 0  }
   0xf LB: > { %3920 = sst [smem:[#allocation8_spill]] %s3232_s15  ;;  %s3372_s17 = sadd.s32 4294967295, %s3236_s16   ;;  %s3236_s16 = sphi %s3357_s16, %s3940_s16   ;;  %s3232_s15 = sphi %s3355_s15, %s3939_s15   ;;  %s3228_s30 = sphi %s3353_s30, %s3938_s30   ;;  %s3224_s0 = sphi %s3351_s0, %s3937_s0  }
  0x10   : > { %s2803_s20 = sadd.s32 4294967294, %s3236_s16   ;;  %s3376_s21 = sadd.s32 1, %s3236_s16  }
  0x11   : > { %s415_s1 = sadd.s32 1, %s3232_s15  ;;  %s412_s22 = ssub.s32 %s3236_s16, %s3376_s21 }
  0x12   : > { %p425_p0 = scmp.ne.s32.totalorder %s3232_s15, %s3228_s30  ;;  %p413_p1 = scmp.eq.s32.totalorder %s412_s22, 0 }
  0x13   : > { %p426_p2 = scmp.eq.s32.totalorder %s3372_s17, 1  ;;  %p431_p3 = scmp.ne.s32.totalorder %s3228_s30, %s3224_s0 }
  0x14   : > { %p432_p4 = scmp.eq.s32.totalorder %s2803_s20, 1  ;;  %p2806_p7 = scmp.ge.s32.totalorder %s3236_s16, 1 }
  0x15   : > { %s3387_s2 = scalar_select %p413_p1, %s3232_s15, %s415_s1  }
  0x16   : > { %p3389_p5 = por %p426_p2, %p425_p0  ;;  %p3393_p6 = por %p432_p4, %p431_p3 }
  0x17   : > { %3921 = sst [smem:[#allocation9_spill]] %s3387_s2  ;;  %p538_p8 = scmp.lt.s32.totalorder %s3236_s16, 3 }
  0x19   : > { %p539_p9 = pnand %p2806_p7, %p538_p8 }
  0x1a   : > { %s3924_s26 = sld [smem:[#allocation13_spill]] (!%p539_p9)  ;;  %p603_p10 = scmp.lt.s32.totalorder (!%p539_p9), %s3372_s17, 1 }
  0x1b   : > { %542 = sbr.rel (%p539_p9) target bundleno = 2996 (0xbb4), region = 88  ;;  %s3925_s2 = sld [smem:[#allocation10_spill]] (!%p539_p9) }
  0x1c   : > { %s3926_s4 = sld [smem:[#allocation14_spill]] (!%p539_p9)  ;;  %s3238_s27 = smov (!%p539_p9), 112  }
  0x1d   : > { %s3239_s28 = smov (!%p539_p9), 120   ;;  %s3241_s1 = smov (!%p539_p9), 96  }
  0x1e   : > { %s3908_s22 = smov (!%p539_p9), 64   ;;  %s3638_s25 = sand.u32 (!%p539_p9), 1, %s3228_s30  }
  0x1f   : > { %s2808_s3 = sshll.u32 (!%p539_p9), %s3638_s25, 4  ;;  %s3928_s5 = sld [smem:[#allocation15_spill]] (!%p539_p9) }
  0x20   : > { %v2947_v0 = vld [vmem:[%s3924_s26 + $0x8] sm:$0xff]  ;;  %v2946_v1 = vld [vmem:[%s3924_s26] sm:$0xff]  ;;  %s3407_s29 = scalar_select %p603_p10, %s3372_s17, 1  ;;  %vm639_vm0 = vcmask 261120   ;;  %v3243_v16 = vmov 1983009808  }
  0x21   : > { %649 = vmatpush.bf16.msra.mxu0 %v2947_v0  ;;  %v672_v17 = vunpack.c.l.s4 %v3243_v16  ;;  %vm667_vm1 = vcmask 1047556   ;;  %v3244_v24 = vmov 1934713408   ;;  %vm1339_vm2 = vcmask 1043456   ;;  %s3929_s6 = sld [smem:[#allocation16_spill]] }
  0x22   : > { %s3909_s20 = sshll.u32 %s3407_s29, 3  ;;  %v3110_v4 = vld [vmem:[%s3926_s4] ss:$0 sm:$0xff]  ;;  %v696_v25 = vunpack.c.l.s4 %v3244_v24  ;;  %vm1335_vm3 = vcmask 64512   ;;  %vm1517_vm8 = vcmask 60416   ;;  %s3930_s4 = sshll.u32 %s3407_s29, 3 }
  0x23   : > { %s3415_s15 = scalar_lea.vmem %s3925_s2, %s3909_s20  ;;  %s3240_s2 = smov 104   ;;  %v3441_v23 = vunpack.c.0.s8 %v672_v17 }
  0x24   : > { %v615_v2 = vld [vmem:[%s3415_s15] sm:$0xff]  ;;  %v3451_v37 = vunpack.c.0.s8 %v696_v25  ;;  %s3932_s7 = sld [smem:[#allocation17_spill]] }
  0x25   : > { %650 = vmatpush.bf16.msra.mxu0 %v2946_v1  ;;  %v618_v3 = vpack.c.bf16 %v615_v2, %v615_v2  ;;  %s3933_s8 = sld [smem:[#allocation18_spill]] }
  0x28   : > { %2819 = vmatmul.msk.bf16.vlgmr.msra.gmra.mxu0 %vm639_vm0, %v618_v3 }
  0xa5   : > { %v652_v5 = vpop.f32.mrf.mxu0 }
  0xa6   : > { %v3422_v6 = vadd.f32 %v3110_v4, %v652_v5 }
  0xa8   : > { %660 = vrot.lane.b32.xlu1 %v3422_v6, %s3238_s27  ;;  %657 = vrot.lane.b32.xlu0 %v3422_v6, %s3239_s28  ;;  %s3927_s27 = sld [smem:[#allocation11_spill]] }
  0xad   : > { %v654_v7 = vpop.f32.mrf.mxu0 }
  0xae   : > { %s609_s28 = scalar_lea.vmem %s3927_s27, %s3407_s29 }
  0xb0   : > { %663 = vrot.lane.b32.xlu0 %v3422_v6, %s3240_s2  ;;  %s3245_s2 = smov 24  }
 0x11a   : > { %v3427_v8 = vpop.permute.xlu0 %657  ;;  %v3431_v10 = vpop.permute.xlu1 %660 }
 0x11b   : > { %v3027_v9 = vpack.i.bf16 %v3422_v6, %v3427_v8 }
 0x11d   : > { %3028 = vrot.lane.b32.xlu1 %v3027_v9, %s3241_s1 }
 0x122   : > { %v3433_v11 = vpop.permute.xlu0 %663 }
 0x123   : > { %v3437_v12 = vpack.i.bf16 %v3431_v10, %v3433_v11 }
 0x125   : > { %3033 = vrot.lane.b32.xlu2 %v3437_v12, %s3241_s1  ;;  %s3246_s1 = smov 16  }
 0x12d   : > { %3038 = vrot.lane.b32.xlu2 %v3027_v9, %s3908_s22 }
 0x17f   : > { %v3034_v13 = vpop.permute.xlu2 %3033 }
 0x180   : > { %v3036_v14 = vunpack.i.h.bf16 %v3034_v13  ;;  %v3035_v15 = vunpack.i.l.bf16 %v3034_v13 }
 0x182   : > { %v743_v19 = vrot.slane %v3036_v14, 4  ;;  %v755_v20 = vrot.slane %v3035_v15, 4 }
 0x187   : > { %v3465_v1 = vpop.permute.xlu2 %3038 }
 0x18f   : > { %v3029_v18 = vpop.permute.xlu1 %3028 }
 0x190   : > { %v3031_v21 = vunpack.i.h.bf16 %v3029_v18  ;;  %v3030_v22 = vunpack.i.l.bf16 %v3029_v18 }
 0x192   : > { %v745_v26 = vrot.slane %v3031_v21, 4  ;;  %v744_v27 = vsel %vm667_vm1, %v743_v19, %v3031_v21  ;;  %v756_v28 = vsel %vm667_vm1, %v755_v20, %v3030_v22  ;;  %v757_v29 = vrot.slane %v3030_v22, 4 }
 0x193   : > { %v762_v30 = vperm.slane %v756_v28, %v3441_v23  ;;  %v750_v33 = vperm.slane %v744_v27, %v3441_v23 }
 0x194   : > { %v746_v31 = vsel %vm667_vm1, %v3036_v14, %v745_v26  ;;  %v758_v32 = vsel %vm667_vm1, %v3035_v15, %v757_v29 }
 0x195   : > { %v754_v34 = vperm.slane %v746_v31, %v3441_v23  ;;  %v766_v35 = vperm.slane %v758_v32, %v3441_v23  ;;  %v767_v36 = vrot.slane %v762_v30, 4  ;;  %v769_v52 = vrot.slane %v750_v33, 4 }
 0x197   : > { %v779_v38 = vrot.slane %v766_v35, 4  ;;  %v781_v39 = vrot.slane %v754_v34, 4  ;;  %v768_v40 = vsel %vm667_vm1, %v767_v36, %v750_v33  ;;  %v770_v59 = vsel %vm667_vm1, %v762_v30, %v769_v52 }
 0x198   : > { %v774_v41 = vperm.slane %v768_v40, %v3451_v37  ;;  %v778_v60 = vperm.slane %v770_v59, %v3451_v37 }
 0x199   : > { %v782_v42 = vsel %vm667_vm1, %v766_v35, %v781_v39  ;;  %v780_v43 = vsel %vm667_vm1, %v779_v38, %v754_v34 }
 0x19a   : > { %v791_v44 = vrot.slane %v774_v41, 4  ;;  %v790_v45 = vperm.slane %v782_v42, %v3451_v37  ;;  %v786_v46 = vperm.slane %v780_v43, %v3451_v37  ;;  %v799_v50 = vpack.c.bf16 %v774_v41, %v774_v41 }
 0x19b   : > { %v793_v61 = vrot.slane %v778_v60, 4  ;;  %v801_v63 = vpack.c.bf16 %v778_v60, %v778_v60 }
 0x19c   : > { %v792_v47 = vsel %vm667_vm1, 0.0, %v791_v44  ;;  %v797_v48 = vrot.slane %v790_v45, 4  ;;  %v795_v49 = vrot.slane %v786_v46, 4  ;;  %v805_v55 = vpack.c.bf16 %v790_v45, %v790_v45 }
 0x19d   : > { %v800_v51 = vpack.c.bf16 %v792_v47, %v792_v47  ;;  %v803_v58 = vpack.c.bf16 %v786_v46, %v786_v46  ;;  %v794_v62 = vsel %vm667_vm1, 0.0, %v793_v61 }
 0x19e   : > { %v798_v53 = vsel %vm667_vm1, 0.0, %v797_v48  ;;  %v796_v54 = vsel %vm667_vm1, 0.0, %v795_v49  ;;  %v802_v0 = vpack.c.bf16 %v794_v62, %v794_v62 }
 0x19f   : > { %3048 = vxpose.binary.xlu0.c.b16.start.end [1/2] (short) (narrow) %v800_v51, %v799_v50, 16  ;;  %v806_v56 = vpack.c.bf16 %v798_v53, %v798_v53  ;;  %v804_v57 = vpack.c.bf16 %v796_v54, %v796_v54 }
 0x1a1   : > { %3042 = vxpose.binary.xlu1.c.b16.start.end [1/2] (short) (narrow) %v806_v56, %v805_v55, 16 }
 0x1a2   : > { %3045 = vxpose.binary.xlu2.c.b16.start.end [1/2] (short) (narrow) %v804_v57, %v803_v58, 16 }
 0x1b2   : > { %3051 = vxpose.binary.xlu2.c.b16.start.end [1/2] (short) (narrow) %v802_v0, %v801_v63, 16 }
 0x243   : > { %v3046_v2 = vpop.trf.xlu2 }
 0x244   : > { %v1067_v7 = vrot.slane %v3046_v2, 4  ;;  %v669_v2 = vrot.slane %v3422_v6, 4 }
 0x24b   : > { %v3047_v3 = vpop.trf.xlu2  ;;  %v3049_v4 = vpop.trf.xlu0 }
 0x24c   : > { %v1068_v13 = vsel %vm667_vm1, %v1067_v7, %v3049_v4  ;;  %v1095_v16 = vrot.slane %v3047_v3, 4  ;;  %v666_v3 = vrot.slane %v3431_v10, 4  ;;  %v670_v4 = vsel %vm667_vm1, %v3431_v10, %v669_v2 }
 0x24d   : > { %v3043_v5 = vpop.trf.xlu1  ;;  %v1072_v18 = vperm.slane %v1068_v13, %v3441_v23  ;;  %v679_v7 = vrot.slane %v3433_v11, 4 }
 0x24e   : > { %v1073_v9 = vrot.slane %v3043_v5, 4  ;;  %v681_v5 = vrot.slane %v3427_v8, 4  ;;  %v668_v13 = vsel %vm667_vm1, %v666_v3, %v3422_v6 }
 0x24f   : > { %v1081_v25 = vrot.slane %v1072_v18, 4 }
 0x253   : > { %v3052_v14 = vpop.trf.xlu2  ;;  %v3050_v15 = vpop.trf.xlu0 }
 0x254   : > { %v1074_v17 = vsel %vm667_vm1, %v1073_v9, %v3052_v14  ;;  %v1096_v21 = vsel %vm667_vm1, %v1095_v16, %v3050_v15  ;;  %v682_v9 = vsel %vm667_vm1, %v3433_v11, %v681_v5  ;;  %v680_v15 = vsel %vm667_vm1, %v679_v7, %v3427_v8 }
 0x255   : > { %v1078_v19 = vperm.slane %v1074_v17, %v3441_v23  ;;  %v3044_v20 = vpop.trf.xlu1  ;;  %v1100_v27 = vperm.slane %v1096_v21, %v3441_v23  ;;  %v690_v14 = vperm.slane %v682_v9, %v3441_v23  ;;  %v674_v16 = vperm.slane %v668_v13, %v3441_v23 }
 0x256   : > { %v1101_v24 = vrot.slane %v3044_v20, 4  ;;  %v686_v17 = vperm.slane %v680_v15, %v3441_v23 }
 0x257   : > { %v1079_v22 = vrot.slane %v1078_v19, 4  ;;  %v1082_v28 = vsel %vm667_vm1, %v1078_v19, %v1081_v25  ;;  %v1109_v32 = vrot.slane %v1100_v27, 4  ;;  %v693_v20 = vrot.slane %v674_v16, 4 }
 0x258   : > { %v1090_v34 = vperm.slane %v1082_v28, %v3451_v37  ;;  %v691_v21 = vrot.slane %v686_v17, 4 }
 0x259   : > { %v1080_v26 = vsel %vm667_vm1, %v1079_v22, %v1072_v18  ;;  %v703_v18 = vrot.slane %v690_v14, 4  ;;  %v694_v22 = vsel %vm667_vm1, %v686_v17, %v693_v20 }
 0x25a   : > { %v1086_v30 = vperm.slane %v1080_v26, %v3451_v37  ;;  %v1143_v41 = vshrl.u32 %v1090_v34, 16  ;;  %v1093_v58 = vrot.slane %v1090_v34, 4  ;;  %v702_v25 = vperm.slane %v694_v22, %v3451_v37 }
 0x25b   : > { %v3053_v29 = vpop.trf.xlu2 }
 0x25c   : > { %v1102_v31 = vsel %vm667_vm1, %v1101_v24, %v3053_v29  ;;  %v1091_v38 = vrot.slane %v1086_v30, 4  ;;  %v1127_v44 = vshrl.u32 %v1086_v30, 16  ;;  %v1094_v60 = vsel %vm667_vm1, 0, %v1093_v58 }
 0x25d   : > { %v1106_v33 = vperm.slane %v1102_v31, %v3441_v23  ;;  %v1151_v62 = vshrl.u32 %v1094_v60, 16  ;;  %v717_v29 = vrot.slane %v702_v25, 4 }
 0x25e   : > { %v1092_v45 = vsel %vm667_vm1, 0, %v1091_v38 }
 0x25f   : > { %v1107_v35 = vrot.slane %v1106_v33, 4  ;;  %v1110_v36 = vsel %vm667_vm1, %v1106_v33, %v1109_v32  ;;  %v1135_v53 = vshrl.u32 %v1092_v45, 16 }
 0x260   : > { %v1118_v39 = vperm.slane %v1110_v36, %v3451_v37  ;;  %v718_v36 = vsel %vm667_vm1, 0.0, %v717_v29 }
 0x261   : > { %v1108_v40 = vsel %vm667_vm1, %v1107_v35, %v1100_v27  ;;  %v692_v27 = vsel %vm667_vm1, %v691_v21, %v674_v16 }
 0x262   : > { %v1144_v42 = vshrl.u32 %v1118_v39, 16  ;;  %v1114_v43 = vperm.slane %v1108_v40, %v3451_v37  ;;  %v1141_v46 = vpack.i.b16 %v1118_v39, %v1090_v34  ;;  %v1121_v57 = vrot.slane %v1118_v39, 4 }
 0x263   : > { %v698_v28 = vperm.slane %v692_v27, %v3451_v37 }
 0x264   : > { %v1145_v47 = vpack.i.b16 %v1144_v42, %v1143_v41  ;;  %v1128_v48 = vshrl.u32 %v1114_v43, 16  ;;  %v1119_v49 = vrot.slane %v1114_v43, 4  ;;  %v1125_v50 = vpack.i.b16 %v1114_v43, %v1086_v30 }
 0x265   : > { %v1122_v59 = vsel %vm667_vm1, 0, %v1121_v57  ;;  %v715_v34 = vrot.slane %v698_v28, 4  ;;  %v726_v41 = vpack.c.bf16 %v718_v36, %v718_v36 }
 0x266   : > { %3057 = vxpose.binary.xlu0.c.b16.start.end [1/2] (short) (narrow) %v1145_v47, %v1141_v46, 16  ;;  %v1129_v51 = vpack.i.b16 %v1128_v48, %v1127_v44  ;;  %v1120_v52 = vsel %vm667_vm1, 0, %v1119_v49  ;;  %v1152_v61 = vshrl.u32 %v1122_v59, 16  ;;  %v1149_v63 = vpack.i.b16 %v1122_v59, %v1094_v60 }
 0x267   : > { %v1136_v54 = vshrl.u32 %v1120_v52, 16  ;;  %v1133_v55 = vpack.i.b16 %v1120_v52, %v1092_v45  ;;  %v716_v43 = vsel %vm667_vm1, 0.0, %v715_v34  ;;  %v725_v44 = vpack.c.bf16 %v702_v25, %v702_v25 }
 0x268   : > { %3054 = vxpose.binary.xlu1.c.b16.start.end [1/2] (short) (narrow) %v1129_v51, %v1125_v50, 16  ;;  %v1153_v0 = vpack.i.b16 %v1152_v61, %v1151_v62  ;;  %v724_v51 = vpack.c.bf16 %v716_v43, %v716_v43 }
 0x269   : > { %v1137_v56 = vpack.i.b16 %v1136_v54, %v1135_v53 }
 0x26b   : > { %3060 = vxpose.binary.xlu2.c.b16.start.end [1/2] (short) (narrow) %v1137_v56, %v1133_v55, 16  ;;  %v723_v55 = vpack.c.bf16 %v698_v28, %v698_v28 }
 0x276   : > { %3063 = vxpose.binary.xlu0.c.b16.start.end [1/2] (short) (narrow) %v1153_v0, %v1149_v63, 16 }
 0x2e4   : > { %3067 = vrot.lane.b32.xlu0 %v3437_v12, %s3908_s22  ;;  %v678_v12 = vperm.slane %v670_v4, %v3441_v23  ;;  %s2968_s22 = sshll.u32 %s3372_s17, 5 }
 0x2e6   : > { %v705_v10 = vrot.slane %v678_v12, 4  ;;  %v704_v6 = vsel %vm667_vm1, %v703_v18, %v678_v12 }
 0x2e7   : > { %v710_v8 = vperm.slane %v704_v6, %v3451_v37 }
 0x2e8   : > { %v706_v19 = vsel %vm667_vm1, %v690_v14, %v705_v10 }
 0x2e9   : > { %v714_v11 = vperm.slane %v706_v19, %v3451_v37  ;;  %v719_v30 = vrot.slane %v710_v8, 4  ;;  %v727_v45 = vpack.c.bf16 %v710_v8, %v710_v8 }
 0x2eb   : > { %v721_v26 = vrot.slane %v714_v11, 4  ;;  %v720_v35 = vsel %vm667_vm1, 0.0, %v719_v30  ;;  %v729_v38 = vpack.c.bf16 %v714_v11, %v714_v11  ;;  %v886_v54 = vrot.slane %v727_v45, 4 }
 0x2ec   : > { %v728_v39 = vpack.c.bf16 %v720_v35, %v720_v35 }
 0x2ed   : > { %v722_v31 = vsel %vm667_vm1, 0.0, %v721_v26  ;;  %v893_v46 = vrot.slane %v729_v38, 4  ;;  %v888_v2 = vsel %vm667_vm1, %v886_v54, %v723_v55  ;;  %v3041_v55 = vunpack.i.h.bf16 %v3465_v1 }
 0x2ee   : > { %v730_v32 = vpack.c.bf16 %v722_v31, %v722_v31  ;;  %v907_v49 = vrot.slane %v728_v39, 4  ;;  %v892_v15 = vperm.slane %v888_v2, %v3441_v23 }
 0x2ef   : > { %v894_v56 = vsel %vm667_vm1, %v893_v46, %v725_v44 }
 0x2f0   : > { %v913_v40 = vrot.slane %v730_v32, 4  ;;  %v908_v61 = vsel %vm667_vm1, %v907_v49, %v724_v51  ;;  %v898_v62 = vperm.slane %v894_v56, %v3441_v23  ;;  %v3040_v56 = vunpack.i.l.bf16 %v3465_v1 }
 0x2f1   : > { %v912_v5 = vperm.slane %v908_v61, %v3441_v23 }
 0x2f2   : > { %v914_v52 = vsel %vm667_vm1, %v913_v40, %v726_v41  ;;  %v899_v16 = vrot.slane %v898_v62, 4 }
 0x2f3   : > { %v918_v59 = vperm.slane %v914_v52, %v3441_v23 }
 0x2f4   : > { %v900_v11 = vsel %vm667_vm1, %v899_v16, %v892_v15 }
 0x2f5   : > { %v919_v7 = vrot.slane %v918_v59, 4  ;;  %v904_v8 = vperm.slane %v900_v11, %v3451_v37  ;;  %v833_v59 = vrot.slane %v3040_v56, 4 }
 0x2f7   : > { %v920_v19 = vsel %vm667_vm1, %v919_v7, %v912_v5  ;;  %v930_v44 = vshrl.u32 %v904_v8, 16 }
 0x2f8   : > { %v924_v6 = vperm.slane %v920_v19, %v3451_v37 }
 0x2fa   : > { %v925_v28 = vrot.slane %v924_v6, 4  ;;  %v931_v38 = vshrl.u32 %v924_v6, 16  ;;  %v929_v43 = vpack.i.b16 %v924_v6, %v904_v8 }
 0x2fc   : > { %v926_v45 = vsel %vm667_vm1, 0, %v925_v28  ;;  %v3111_v28 = vld [vmem:[%s609_s28] ss:$0 sm:$0xff]  ;;  %s3642_s28 = scalar_lea.vmem [#allocation4], %s2808_s3  ;;  %s3247_s3 = smov 8  }
 0x2fd   : > { %v937_v52 = vshrl.u32 %v926_v45, 16 }
 0x30c   : > { %v3061_v42 = vpop.trf.xlu2 }
 0x312   : > { %v3058_v24 = vpop.trf.xlu0 }
 0x313   : > { %v1283_v48 = vrot.slane %v3058_v24, 4 }
 0x314   : > { %v3055_v47 = vpop.trf.xlu1  ;;  %v3062_v4 = vpop.trf.xlu2 }
 0x315   : > { %v1284_v57 = vsel %vm667_vm1, %v1283_v48, %v3055_v47  ;;  %v932_v48 = vpack.i.b16 %v931_v38, %v930_v44 }
 0x316   : > { %v1288_v63 = vperm.slane %v1284_v57, %v3441_v23 }
 0x31a   : > { %v3059_v33 = vpop.trf.xlu0 }
 0x31b   : > { %v1303_v3 = vrot.slane %v3059_v33, 4  ;;  %v905_v33 = vrot.slane %v904_v8, 4 }
 0x31c   : > { %v3056_v9 = vpop.trf.xlu1 }
 0x31d   : > { %v1304_v10 = vsel %vm667_vm1, %v1303_v3, %v3056_v9  ;;  %v906_v49 = vsel %vm667_vm1, 0, %v905_v33 }
 0x31e   : > { %v1308_v21 = vperm.slane %v1304_v10, %v3441_v23  ;;  %v935_v51 = vpack.i.b16 %v926_v45, %v906_v49 }
 0x322   : > { %v3064_v50 = vpop.trf.xlu0 }
 0x323   : > { %v1289_v53 = vrot.slane %v3064_v50, 4 }
 0x325   : > { %v1290_v58 = vsel %vm667_vm1, %v1289_v53, %v3061_v42  ;;  %v936_v53 = vshrl.u32 %v906_v49, 16 }
 0x326   : > { %v1294_v60 = vperm.slane %v1290_v58, %v3441_v23  ;;  %v821_v58 = vrot.slane %v3041_v55, 4 }
 0x327   : > { %v938_v54 = vpack.i.b16 %v937_v52, %v936_v53 }
 0x328   : > { %v1295_v0 = vrot.slane %v1294_v60, 4 }
 0x32a   : > { %v3065_v12 = vpop.trf.xlu0  ;;  %v1296_v13 = vsel %vm667_vm1, %v1295_v0, %v1288_v63 }
 0x32b   : > { %v1309_v14 = vrot.slane %v3065_v12, 4  ;;  %v1300_v18 = vperm.slane %v1296_v13, %v3451_v37 }
 0x32d   : > { %v1310_v17 = vsel %vm667_vm1, %v1309_v14, %v3062_v4  ;;  %v1301_v24 = vrot.slane %v1300_v18, 4  ;;  %v1326_v27 = vshrl.u32 %v1300_v18, 16 }
 0x32e   : > { %v1314_v20 = vperm.slane %v1310_v17, %v3441_v23 }
 0x32f   : > { %v1302_v31 = vsel %vm667_vm1, 0, %v1301_v24 }
 0x330   : > { %v1315_v22 = vrot.slane %v1314_v20, 4  ;;  %v1332_v40 = vshrl.u32 %v1302_v31, 16 }
 0x332   : > { %v1316_v25 = vsel %vm667_vm1, %v1315_v22, %v1308_v21 }
 0x333   : > { %v1320_v26 = vperm.slane %v1316_v25, %v3451_v37 }
 0x335   : > { %v1325_v29 = vpack.i.b16 %v1320_v26, %v1300_v18  ;;  %v1327_v30 = vshrl.u32 %v1320_v26, 16  ;;  %v1321_v32 = vrot.slane %v1320_v26, 4 }
 0x337   : > { %v1341_v34 = vsel %vm1339_vm2, %v1325_v29, 0  ;;  %v1328_v35 = vpack.i.b16 %v1327_v30, %v1326_v27  ;;  %v1322_v36 = vsel %vm667_vm1, 0, %v1321_v32 }
 0x338   : > { %1350 = vmatpush.bf16.msra.mxu1 %v1341_v34  ;;  %v1331_v39 = vpack.i.b16 %v1322_v36, %v1302_v31  ;;  %v1333_v41 = vshrl.u32 %v1322_v36, 16 }
 0x339   : > { %v1360_v42 = vsel %vm1339_vm2, %v1328_v35, 0 }
 0x33a   : > { %1369 = vmatpush.bf16.msra.mxu2 %v1360_v42  ;;  %v1379_v46 = vsel %vm1339_vm2, %v1331_v39, 0  ;;  %v1334_v47 = vpack.i.b16 %v1333_v41, %v1332_v40 }
 0x33b   : > { %2820 = vmatmul.msk.bf16.vlgmr.msra.gmra.mxu1 %vm1335_vm3, %v929_v43  ;;  %1388 = vmatpush.bf16.msra.mxu3 %v1379_v46 }
 0x33c   : > { %v1398_v50 = vsel %vm1339_vm2, %v1334_v47, 0 }
 0x33d   : > { %2821 = vmatmul.msk.bf16.vlgmr.msra.gmra.mxu2 %vm1335_vm3, %v932_v48  ;;  %1407 = vmatpush.bf16.msrb.mxu1 %v1398_v50 }
 0x33e   : > { %2822 = vmatmul.msk.bf16.vlgmr.msra.gmra.mxu3 %vm1335_vm3, %v935_v51 }
 0x34b   : > { %2823 = vmatmul.msk.bf16.vlgmr.msrb.gmra.mxu1 %vm1335_vm3, %v938_v54 }
 0x356   : > { %v3068_v57 = vpop.permute.xlu0 %3067 }
 0x357   : > { %v3070_v60 = vunpack.i.h.bf16 %v3068_v57  ;;  %v3069_v61 = vunpack.i.l.bf16 %v3068_v57 }
 0x359   : > { %v819_v62 = vrot.slane %v3070_v60, 4  ;;  %v822_v63 = vsel %vm667_vm1, %v3070_v60, %v821_v58  ;;  %v831_v0 = vrot.slane %v3069_v61, 4  ;;  %v834_v2 = vsel %vm667_vm1, %v3069_v61, %v833_v59 }
 0x35a   : > { %v830_v3 = vperm.slane %v822_v63, %v3441_v23  ;;  %v842_v4 = vperm.slane %v834_v2, %v3441_v23 }
 0x35b   : > { %v820_v5 = vsel %vm667_vm1, %v819_v62, %v3041_v55  ;;  %v832_v7 = vsel %vm667_vm1, %v831_v0, %v3040_v56 }
 0x35c   : > { %v826_v1 = vperm.slane %v820_v5, %v3441_v23  ;;  %v857_v9 = vrot.slane %v830_v3, 4  ;;  %v838_v12 = vperm.slane %v832_v7, %v3441_v23  ;;  %v855_v13 = vrot.slane %v842_v4, 4 }
 0x35e   : > { %v845_v14 = vrot.slane %v826_v1, 4  ;;  %v843_v15 = vrot.slane %v838_v12, 4  ;;  %v856_v16 = vsel %vm667_vm1, %v855_v13, %v830_v3  ;;  %v858_v10 = vsel %vm667_vm1, %v842_v4, %v857_v9 }
 0x35f   : > { %v862_v17 = vperm.slane %v856_v16, %v3451_v37  ;;  %v866_v45 = vperm.slane %v858_v10, %v3451_v37 }
 0x360   : > { %v844_v18 = vsel %vm667_vm1, %v843_v15, %v826_v1  ;;  %v846_v19 = vsel %vm667_vm1, %v838_v12, %v845_v14 }
 0x361   : > { %v871_v20 = vrot.slane %v862_v17, 4  ;;  %v850_v11 = vperm.slane %v844_v18, %v3451_v37  ;;  %v879_v6 = vpack.c.bf16 %v862_v17, %v862_v17  ;;  %v873_v46 = vrot.slane %v866_v45, 4 }
 0x362   : > { %v881_v48 = vpack.c.bf16 %v866_v45, %v866_v45  ;;  %v854_v50 = vperm.slane %v846_v19, %v3451_v37 }
 0x363   : > { %v872_v21 = vsel %vm667_vm1, 0.0, %v871_v20  ;;  %v867_v22 = vrot.slane %v850_v11, 4  ;;  %v875_v8 = vpack.c.bf16 %v850_v11, %v850_v11  ;;  %v874_v47 = vsel %vm667_vm1, 0.0, %v873_v46 }
 0x364   : > { %v880_v24 = vpack.c.bf16 %v872_v21, %v872_v21  ;;  %v882_v49 = vpack.c.bf16 %v874_v47, %v874_v47  ;;  %v869_v51 = vrot.slane %v854_v50, 4  ;;  %v877_v53 = vpack.c.bf16 %v854_v50, %v854_v50 }
 0x365   : > { %v868_v25 = vsel %vm667_vm1, 0.0, %v867_v22 }
 0x366   : > { %3071 = vxpose.binary.xlu0.c.b16.start.end [1/2] (short) (narrow) %v880_v24, %v879_v6, 16  ;;  %v876_v26 = vpack.c.bf16 %v868_v25, %v868_v25  ;;  %v870_v52 = vsel %vm667_vm1, 0.0, %v869_v51 }
 0x367   : > { %v878_v54 = vpack.c.bf16 %v870_v52, %v870_v52 }
 0x368   : > { %3074 = vxpose.binary.xlu1.c.b16.start.end [1/2] (short) (narrow) %v876_v26, %v875_v8, 16 }
 0x3b8   : > { %v1352_v27 = vpop.f32.mrf.mxu1 }
 0x3b9   : > { %v1353_v33 = vadd.f32 %v3111_v28, %v1352_v27 }
 0x3bb   : > { %v1413_v35 = vsel %vm1335_vm3, %v1353_v33, -inf }
 0x3c0   : > { %v1354_v29 = vpop.f32.mrf.mxu1  ;;  %v1371_v30 = vpop.f32.mrf.mxu2 }
 0x3c1   : > { %v1390_v31 = vpop.f32.mrf.mxu3  ;;  %v3582_v40 = vadd.f32 %v3111_v28, %v1371_v30 }
 0x3c2   : > { %v1391_v32 = vadd.f32 %v3111_v28, %v1390_v31 }
 0x3c3   : > { %v1416_v41 = vsel %vm1335_vm3, %v3582_v40, -inf }
 0x3c4   : > { %v1419_v34 = vsel %vm1335_vm3, %v1391_v32, -inf }
 0x3c5   : > { %1420 = vmax.xlane.f32.xlu2 %v1419_v34 }
 0x3c8   : > { %v1373_v36 = vpop.f32.mrf.mxu2  ;;  %1414 = vmax.xlane.f32.xlu1 %v1413_v35  ;;  %v1409_v38 = vpop.f32.mrf.mxu1 }
 0x3c9   : > { %v1392_v39 = vpop.f32.mrf.mxu3  ;;  %v1410_v43 = vadd.f32 %v3111_v28, %v1409_v38 }
 0x3cb   : > { %v1422_v44 = vsel %vm1335_vm3, %v1410_v43, -inf }
 0x3d0   : > { %1417 = vmax.xlane.f32.xlu1 %v1416_v41  ;;  %v1411_v42 = vpop.f32.mrf.mxu1 }
 0x3d8   : > { %1423 = vmax.xlane.f32.xlu1 %v1422_v44 }
 0x3ee   : > { %3077 = vxpose.binary.xlu2.c.b16.start.end [1/2] (short) (narrow) %v882_v49, %v881_v48, 16 }
 0x412   : > { %3080 = vxpose.binary.xlu1.c.b16.start.end [1/2] (short) (narrow) %v878_v54, %v877_v53, 16  ;;  %v3072_v13 = vpop.trf.xlu0 }
 0x413   : > { %v1650_v14 = vrot.slane %v3072_v13, 4 }
 0x414   : > { %v3075_v55 = vpop.trf.xlu1 }
 0x415   : > { %v1651_v16 = vsel %vm667_vm1, %v1650_v14, %v3075_v55 }
 0x416   : > { %v1655_v18 = vperm.slane %v1651_v16, %v3441_v23 }
 0x418   : > { %v1664_v21 = vrot.slane %v1655_v18, 4 }
 0x41a   : > { %v3073_v10 = vpop.trf.xlu0 }
 0x41b   : > { %v1678_v19 = vrot.slane %v3073_v10, 4 }
 0x41c   : > { %v3076_v56 = vpop.trf.xlu1 }
 0x41d   : > { %v1679_v24 = vsel %vm667_vm1, %v1678_v19, %v3076_v56 }
 0x41e   : > { %v1683_v27 = vperm.slane %v1679_v24, %v3441_v23 }
 0x438   : > { %v1421_v57 = vpop.xlane.xlu2 %1420 }
 0x439   : > { %v1427_v58 = vsub.f32 %v1391_v32, %v1421_v57 }
 0x43b   : > { %v1433_v59 = vmul.f32 1.442695, %v1427_v58  ;;  %v1415_v60 = vpop.xlane.xlu1 %1414 }
 0x43c   : > { %v1425_v0 = vsub.f32 %v1353_v33, %v1415_v60  ;;  %v1692_v33 = vrot.slane %v1683_v27, 4 }
 0x43d   : > { %3119 = vpow2.f32 %v1433_v59 }
 0x43e   : > { %v1429_v2 = vmul.f32 1.442695, %v1425_v0 }
 0x440   : > { %3121 = vpow2.f32 %v1429_v2 }
 0x443   : > { %v3591_v61 = vpop.eup %3119  ;;  %v3593_v62 = vpop.xlane.xlu1 %1417 }
 0x444   : > { %v1443_v63 = vsel %vm1335_vm3, %v3591_v61, 0.0 }
 0x446   : > { %v3597_v7 = vpop.eup %3121 }
 0x447   : > { %v1437_v1 = vsel %vm1335_vm3, %v3597_v7, 0.0 }
 0x44b   : > { %v1424_v3 = vpop.xlane.xlu1 %1423 }
 0x44c   : > { %v1428_v4 = vsub.f32 %v1410_v43, %v1424_v3 }
 0x44e   : > { %v1435_v5 = vmul.f32 1.442695, %v1428_v4 }
 0x450   : > { %3123 = vpow2.f32 %v1435_v5 }
 0x456   : > { %v3601_v9 = vpop.eup %3123 }
 0x457   : > { %v1446_v12 = vsel %vm1335_vm3, %v3601_v9, 0.0 }
 0x45f   : > { %1444 = vadd.xlane.f32.xlu2 %v1443_v63 }
 0x472   : > { %1438 = vadd.xlane.f32.xlu1 %v1437_v1 }
 0x47a   : > { %1447 = vadd.xlane.f32.xlu1 %v1446_v12 }
 0x48f   : > { %v3078_v15 = vpop.trf.xlu2 }
 0x490   : > { %v1656_v17 = vrot.slane %v3078_v15, 4 }
 0x497   : > { %v3079_v6 = vpop.trf.xlu2 }
 0x498   : > { %v1684_v26 = vrot.slane %v3079_v6, 4 }
 0x4be   : > { %v3081_v20 = vpop.trf.xlu1 }
 0x4bf   : > { %v1657_v11 = vsel %vm667_vm1, %v1656_v17, %v3081_v20 }
 0x4c0   : > { %v1661_v22 = vperm.slane %v1657_v11, %v3441_v23 }
 0x4c2   : > { %v1662_v25 = vrot.slane %v1661_v22, 4  ;;  %v1665_v8 = vsel %vm667_vm1, %v1661_v22, %v1664_v21 }
 0x4c3   : > { %v1673_v29 = vperm.slane %v1665_v8, %v3451_v37 }
 0x4c4   : > { %v1663_v28 = vsel %vm667_vm1, %v1662_v25, %v1655_v18 }
 0x4c5   : > { %v3615_v30 = vperm.slane %v1663_v28, %v3451_v37  ;;  %v1676_v35 = vrot.slane %v1673_v29, 4  ;;  %v1726_v43 = vshrl.u32 %v1673_v29, 16 }
 0x4c6   : > { %v3082_v31 = vpop.trf.xlu1 }
 0x4c7   : > { %v1685_v32 = vsel %vm667_vm1, %v1684_v26, %v3082_v31  ;;  %v1674_v39 = vrot.slane %v3615_v30, 4  ;;  %v1677_v46 = vsel %vm667_vm1, 0, %v1676_v35  ;;  %v1710_v56 = vshrl.u32 %v3615_v30, 16 }
 0x4c8   : > { %v1689_v34 = vperm.slane %v1685_v32, %v3441_v23  ;;  %v1734_v54 = vshrl.u32 %v1677_v46, 16 }
 0x4c9   : > { %v1675_v49 = vsel %vm667_vm1, 0, %v1674_v39 }
 0x4ca   : > { %v1690_v36 = vrot.slane %v1689_v34, 4  ;;  %v1693_v38 = vsel %vm667_vm1, %v1689_v34, %v1692_v33  ;;  %v1718_v59 = vshrl.u32 %v1675_v49, 16 }
 0x4cb   : > { %v1701_v41 = vperm.slane %v1693_v38, %v3451_v37 }
 0x4cc   : > { %v1691_v42 = vsel %vm667_vm1, %v1690_v36, %v1683_v27 }
 0x4cd   : > { %v3624_v44 = vperm.slane %v1691_v42, %v3451_v37  ;;  %v1727_v45 = vshrl.u32 %v1701_v41, 16  ;;  %v1704_v47 = vrot.slane %v1701_v41, 4  ;;  %v1724_v48 = vpack.i.b16 %v1701_v41, %v1673_v29 }
 0x4cf   : > { %v1728_v50 = vpack.i.b16 %v1727_v45, %v1726_v43  ;;  %v1705_v51 = vsel %vm667_vm1, 0, %v1704_v47  ;;  %v1702_v52 = vrot.slane %v3624_v44, 4  ;;  %v1708_v53 = vpack.i.b16 %v3624_v44, %v3615_v30 }
 0x4d0   : > { %v1735_v55 = vshrl.u32 %v1705_v51, 16  ;;  %v1711_v57 = vshrl.u32 %v3624_v44, 16  ;;  %v1732_v63 = vpack.i.b16 %v1705_v51, %v1677_v46  ;;  %v1426_v51 = vsub.f32 %v3582_v40, %v3593_v62 }
 0x4d1   : > { %3089 = vxpose.binary.xlu2.c.b16.start.end [1/2] (short) (narrow) %v1728_v50, %v1724_v48, 16  ;;  %v1703_v58 = vsel %vm667_vm1, 0, %v1702_v52 }
 0x4d2   : > { %v1445_v60 = vpop.xlane.xlu2 %1444  ;;  %v1736_v0 = vpack.i.b16 %v1735_v55, %v1734_v54  ;;  %v1719_v2 = vshrl.u32 %v1703_v58, 16  ;;  %v3635_v3 = vpack.i.b16 %v1711_v57, %v1710_v56  ;;  %v1716_v4 = vpack.i.b16 %v1703_v58, %v1675_v49 }
 0x4d3   : > { %3125 = vrcp.f32 %v1445_v60  ;;  %v1490_v14 = vand.u32 2147483648, %v1445_v60  ;;  %v1488_v16 = vand.u32 2147483647, %v1445_v60  ;;  %vm1484_vm5 = vweird.f32 %v1445_v60 }
 0x4d4   : > { %3083 = vxpose.binary.xlu0.c.b16.start.end [1/2] (short) (narrow) %v1736_v0, %v1732_v63, 16  ;;  %v1720_v5 = vpack.i.b16 %v1719_v2, %v1718_v59  ;;  %v1431_v52 = vmul.f32 1.442695, %v1426_v51 }
 0x4d5   : > { %v1491_v17 = vor.u32 1.1754944e-38, %v1490_v14  ;;  %vm1489_vm7 = vcmp.eq.f32.partialorder %v1488_v16, 8.507059e+37 }
 0x4d6   : > { %3086 = vxpose.binary.xlu1.c.b16.start.end [1/2] (short) (narrow) %v1720_v5, %v1716_v4, 16 }
 0x4d9   : > { %v3126_v1 = vpop.eup %3125 }
 0x4da   : > { %v1480_v12 = vmul.f32 %v3126_v1, %v1445_v60  ;;  %vm1485_vm4 = vweird.f32 %v3126_v1 }
 0x4db   : > { %vm1486_vm6 = vmor %vm1484_vm5, %vm1485_vm4 }
 0x4dc   : > { %v1481_v13 = vsub.f32 1.0, %v1480_v12 }
 0x4de   : > { %v1482_v15 = vmul.f32 %v3126_v1, %v1481_v13 }
 0x4e0   : > { %v1483_v10 = vadd.f32 %v3126_v1, %v1482_v15 }
 0x4e2   : > { %v1487_v18 = vsel %vm1486_vm6, %v3126_v1, %v1483_v10 }
 0x4e3   : > { %v1492_v19 = vsel %vm1489_vm7, %v1491_v17, %v1487_v18 }
 0x4e4   : > { %v1511_v20 = vmul.f32 %v3591_v61, %v1492_v19 }
 0x4e5   : > { %v1439_v11 = vpop.xlane.xlu1 %1438 }
 0x4e6   : > { %3127 = vrcp.f32 %v1439_v11  ;;  %v1515_v21 = vpack.c.bf16 %v1511_v20, %v1511_v20  ;;  %v1460_v26 = vand.u32 2147483648, %v1439_v11  ;;  %v1458_v61 = vand.u32 2147483647, %v1439_v11 }
 0x4e7   : > { %vm1454_vm10 = vweird.f32 %v1439_v11 }
 0x4e8   : > { %1520 = vst.msk [vmem:[%s3642_s28 + $0x8] sm:$0xf] %vm1517_vm8, %v1515_v21  ;;  %v1960_v22 = vsel %vm1335_vm3, %v1515_v21, 0  ;;  %v1461_v31 = vor.u32 1.1754944e-38, %v1460_v26  ;;  %vm1459_vm12 = vcmp.eq.f32.partialorder %v1458_v61, 8.507059e+37 }
 0x4e9   : > { %1969 = vmatpush.bf16.xpose.msrb.mxu0 %v1960_v22 }
 0x4ec   : > { %v3128_v6 = vpop.eup %3127 }
 0x4ed   : > { %v1450_v24 = vmul.f32 %v3128_v6, %v1439_v11  ;;  %v1448_v25 = vpop.xlane.xlu1 %1447  ;;  %vm1455_vm9 = vweird.f32 %v3128_v6 }
 0x4ee   : > { %3129 = vrcp.f32 %v1448_v25  ;;  %vm1456_vm11 = vmor %vm1454_vm10, %vm1455_vm9  ;;  %v1505_v38 = vand.u32 2147483648, %v1448_v25  ;;  %v1503_v41 = vand.u32 2147483647, %v1448_v25  ;;  %vm1499_vm14 = vweird.f32 %v1448_v25 }
 0x4ef   : > { %v1451_v8 = vsub.f32 1.0, %v1450_v24  ;;  %3131 = vpow2.f32 %v1431_v52  ;;  %vm2247_vm9 = vcmask 195584  }
 0x4f0   : > { %v1506_v46 = vor.u32 1.1754944e-38, %v1505_v38  ;;  %vm1504_vm2 = vcmp.eq.f32.partialorder %v1503_v41, 8.507059e+37 }
 0x4f1   : > { %v1452_v27 = vmul.f32 %v3128_v6, %v1451_v8 }
 0x4f3   : > { %v1453_v28 = vadd.f32 %v3128_v6, %v1452_v27 }
 0x4f4   : > { %v3130_v29 = vpop.eup %3129 }
 0x4f5   : > { %v1495_v32 = vmul.f32 %v3130_v29, %v1448_v25  ;;  %v1457_v33 = vsel %vm1456_vm11, %v3128_v6, %v1453_v28  ;;  %vm1500_vm13 = vweird.f32 %v3130_v29  ;;  %v3132_v54 = vpop.eup %3131 }
 0x4f6   : > { %v1462_v34 = vsel %vm1459_vm12, %v1461_v31, %v1457_v33  ;;  %vm1501_vm15 = vmor %vm1499_vm14, %vm1500_vm13  ;;  %v1440_v55 = vsel %vm1335_vm3, %v3132_v54, 0.0  ;;  %vm2503_vm14 = vcmask 523264  }
 0x4f7   : > { %v1496_v35 = vsub.f32 1.0, %v1495_v32  ;;  %v1509_v36 = vmul.f32 %v3597_v7, %v1462_v34 }
 0x4f9   : > { %v1497_v39 = vmul.f32 %v3130_v29, %v1496_v35  ;;  %v1513_v42 = vpack.c.bf16 %v1509_v36, %v1509_v36 }
 0x4fb   : > { %v1498_v43 = vadd.f32 %v3130_v29, %v1497_v39  ;;  %1518 = vst.msk [vmem:[%s3642_s28] sm:$0xf] %vm1517_vm8, %v1513_v42  ;;  %v1922_v45 = vsel %vm1335_vm3, %v1513_v42, 0 }
 0x4fc   : > { %1931 = vmatpush.bf16.xpose.msrb.mxu2 %v1922_v45 }
 0x4fd   : > { %v1502_v47 = vsel %vm1501_vm15, %v3130_v29, %v1498_v43 }
 0x4fe   : > { %v1507_v48 = vsel %vm1504_vm2, %v1506_v46, %v1502_v47 }
 0x4ff   : > { %v1512_v7 = vmul.f32 %v3601_v9, %v1507_v48 }
 0x501   : > { %v1516_v49 = vpack.c.bf16 %v1512_v7, %v1512_v7 }
 0x503   : > { %1521 = vst.msk [vmem:[%s3642_s28 + $0xc] sm:$0xf] %vm1517_vm8, %v1516_v49  ;;  %v1979_v50 = vsel %vm1335_vm3, %v1516_v49, 0 }
 0x504   : > { %1988 = vmatpush.bf16.xpose.msra.mxu1 %v1979_v50 }
 0x545   : > { %1441 = vadd.xlane.f32.xlu0 %v1440_v55 }
 0x56e   : > { %3092 = vxpose.binary.xlu0.c.b16.start.end [1/2] (short) (narrow) %v3635_v3, %v1708_v53, 16 }
 0x572   : > { %v3090_v12 = vpop.trf.xlu2 }
 0x573   : > { %v1866_v14 = vrot.slane %v3090_v12, 4 }
 0x57a   : > { %v3091_v11 = vpop.trf.xlu2 }
 0x57b   : > { %v1886_v6 = vrot.slane %v3091_v11, 4 }
 0x580   : > { %v3084_v9 = vpop.trf.xlu0 }
 0x581   : > { %v1872_v1 = vrot.slane %v3084_v9, 4 }
 0x582   : > { %v3087_v5 = vpop.trf.xlu1 }
 0x583   : > { %v1873_v13 = vsel %vm667_vm1, %v1872_v1, %v3087_v5 }
 0x584   : > { %v1877_v15 = vperm.slane %v1873_v13, %v3441_v23 }
 0x586   : > { %v1878_v19 = vrot.slane %v1877_v15, 4 }
 0x588   : > { %v3085_v56 = vpop.trf.xlu0 }
 0x589   : > { %v1892_v16 = vrot.slane %v3085_v56, 4 }
 0x58a   : > { %v3088_v10 = vpop.trf.xlu1 }
 0x58b   : > { %v1893_v21 = vsel %vm667_vm1, %v1892_v16, %v3088_v10 }
 0x58c   : > { %v1897_v24 = vperm.slane %v1893_v21, %v3441_v23 }
 0x58e   : > { %v1898_v27 = vrot.slane %v1897_v24, 4 }
 0x5b8   : > { %v1442_v57 = vpop.xlane.xlu0 %1441 }
 0x5b9   : > { %3133 = vrcp.f32 %v1442_v57  ;;  %v1475_v40 = vand.u32 2147483648, %v1442_v57  ;;  %v1473_v63 = vand.u32 2147483647, %v1442_v57  ;;  %vm1469_vm5 = vweird.f32 %v1442_v57 }
 0x5bb   : > { %v1476_v2 = vor.u32 1.1754944e-38, %v1475_v40  ;;  %vm1474_vm7 = vcmp.eq.f32.partialorder %v1473_v63, 8.507059e+37 }
 0x5bf   : > { %v3134_v58 = vpop.eup %3133 }
 0x5c0   : > { %v1465_v59 = vmul.f32 %v3134_v58, %v1442_v57  ;;  %vm1470_vm4 = vweird.f32 %v3134_v58 }
 0x5c1   : > { %vm1471_vm6 = vmor %vm1469_vm5, %vm1470_vm4 }
 0x5c2   : > { %v1466_v60 = vsub.f32 1.0, %v1465_v59 }
 0x5c4   : > { %v1467_v62 = vmul.f32 %v3134_v58, %v1466_v60 }
 0x5c6   : > { %v1468_v0 = vadd.f32 %v3134_v58, %v1467_v62 }
 0x5c8   : > { %v1472_v4 = vsel %vm1471_vm6, %v3134_v58, %v1468_v0 }
 0x5c9   : > { %v1477_v30 = vsel %vm1474_vm7, %v1476_v2, %v1472_v4 }
 0x5ca   : > { %v1510_v44 = vmul.f32 %v3132_v54, %v1477_v30 }
 0x5cc   : > { %v1514_v53 = vpack.c.bf16 %v1510_v44, %v1510_v44 }
 0x5ce   : > { %1519 = vst.msk [vmem:[%s3642_s28 + $0x4] sm:$0xf] %vm1517_vm8, %v1514_v53  ;;  %v1941_v3 = vsel %vm1335_vm3, %v1514_v53, 0  ;;  %vm2245_vm8 = vcmask 130048  }
 0x5cf   : > { %1950 = vmatpush.bf16.xpose.msrb.mxu3 %v1941_v3 }
 0x61a   : > { %v3093_v17 = vpop.trf.xlu0 }
 0x61b   : > { %v1867_v18 = vsel %vm667_vm1, %v1866_v14, %v3093_v17 }
 0x61c   : > { %v1871_v20 = vperm.slane %v1867_v18, %v3441_v23 }
 0x61e   : > { %v1879_v22 = vsel %vm667_vm1, %v1878_v19, %v1871_v20 }
 0x61f   : > { %v1883_v25 = vperm.slane %v1879_v22, %v3451_v37 }
 0x621   : > { %v1884_v28 = vrot.slane %v1883_v25, 4  ;;  %v1909_v32 = vshrl.u32 %v1883_v25, 16 }
 0x622   : > { %v3094_v8 = vpop.trf.xlu0 }
 0x623   : > { %v1887_v26 = vsel %vm667_vm1, %v1886_v6, %v3094_v8  ;;  %v1885_v35 = vsel %vm667_vm1, 0, %v1884_v28 }
 0x624   : > { %v1891_v61 = vperm.slane %v1887_v26, %v3441_v23  ;;  %v1915_v42 = vshrl.u32 %v1885_v35, 16 }
 0x626   : > { %v1899_v29 = vsel %vm667_vm1, %v1898_v27, %v1891_v61 }
 0x627   : > { %v1903_v31 = vperm.slane %v1899_v29, %v3451_v37 }
 0x629   : > { %v1908_v33 = vpack.i.b16 %v1903_v31, %v1883_v25  ;;  %v1910_v34 = vshrl.u32 %v1903_v31, 16  ;;  %v1904_v36 = vrot.slane %v1903_v31, 4 }
 0x62b   : > { %2824 = vmatmul.msk.bf16.vlgmr.msrb.gmra.mxu2 %vm1335_vm3, %v1908_v33  ;;  %v1911_v38 = vpack.i.b16 %v1910_v34, %v1909_v32  ;;  %v1905_v39 = vsel %vm667_vm1, 0, %v1904_v36 }
 0x62c   : > { %v1914_v41 = vpack.i.b16 %v1905_v39, %v1885_v35  ;;  %v1916_v43 = vshrl.u32 %v1905_v39, 16 }
 0x62d   : > { %2825 = vmatmul.msk.bf16.vlgmr.msrb.gmra.mxu3 %vm1335_vm3, %v1911_v38 }
 0x62e   : > { %v1917_v45 = vpack.i.b16 %v1916_v43, %v1915_v42  ;;  %2826 = vmatmul.msk.bf16.vlgmr.msrb.gmra.mxu0 %vm1335_vm3, %v1914_v41 }
 0x630   : > { %2827 = vmatmul.msk.bf16.vlgmr.msra.gmra.mxu1 %vm1335_vm3, %v1917_v45 }
 0x6ab   : > { %v1971_v46 = vpop.f32.mrf.mxu0 }
 0x6ad   : > { %v1990_v47 = vpop.f32.mrf.mxu1 }
 0x6ae   : > { %v1933_v48 = vpop.f32.mrf.mxu2 }
 0x6af   : > { %v3095_v7 = vpack.i.bf16 %v1933_v48, %v1971_v46 }
 0x6b0   : > { %v1952_v49 = vpop.f32.mrf.mxu3 }
 0x6b1   : > { %3096 = vxpose.xlu0.b32.start.end [1/1] (short) (narrow) %v3095_v7, 8  ;;  %v3102_v54 = vpack.i.bf16 %v1952_v49, %v1990_v47 }
 0x6b3   : > { %v1973_v50 = vpop.f32.mrf.mxu0 }
 0x6b5   : > { %v1992_v51 = vpop.f32.mrf.mxu1 }
 0x6b6   : > { %v1935_v52 = vpop.f32.mrf.mxu2 }
 0x6b8   : > { %v1954_v55 = vpop.f32.mrf.mxu3 }
 0x6b9   : > { %3103 = vxpose.xlu0.b32.start.end [1/1] (short) (narrow) %v3102_v54, 8 }
 0x755   : > { %v3097_v9 = vpop.trf.xlu0 }
 0x756   : > { %v3101_v56 = vunpack.i.h.bf16 %v3097_v9  ;;  %v3098_v57 = vunpack.i.l.bf16 %v3097_v9 }
 0x758   : > { %v2124_v58 = vrot.slane %v3101_v56, 4  ;;  %v2122_v59 = vrot.slane %v3098_v57, 4 }
 0x75a   : > { %v2123_v60 = vsel %vm667_vm1, %v2122_v59, %v3101_v56  ;;  %v2125_v40 = vsel %vm667_vm1, %v3098_v57, %v2124_v58 }
 0x75b   : > { %v2129_v2 = vperm.slane %v2123_v60, %v3441_v23  ;;  %v2133_v4 = vperm.slane %v2125_v40, %v3441_v23  ;;  %v2948_v60 = vld [vmem:[%s3928_s5] sm:$0xff] }
 0x75d   : > { %v3104_v62 = vpop.trf.xlu0  ;;  %v2148_v5 = vrot.slane %v2129_v2, 4  ;;  %v2160_v1 = vrot.slane %v2133_v4, 4 }
 0x75e   : > { %v3108_v63 = vunpack.i.h.bf16 %v3104_v62  ;;  %v3105_v0 = vunpack.i.l.bf16 %v3104_v62 }
 0x760   : > { %v2136_v30 = vrot.slane %v3108_v63, 4  ;;  %v2134_v44 = vrot.slane %v3105_v0, 4 }
 0x762   : > { %v2135_v53 = vsel %vm667_vm1, %v2134_v44, %v3108_v63  ;;  %v2137_v3 = vsel %vm667_vm1, %v3105_v0, %v2136_v30  ;;  %v3112_v44 = vld [vmem:[%s3929_s6] ss:$0 sm:$0xff] }
 0x763   : > { %v2141_v12 = vperm.slane %v2135_v53, %v3441_v23  ;;  %v2145_v13 = vperm.slane %v2137_v3, %v3441_v23 }
 0x765   : > { %v2146_v14 = vrot.slane %v2141_v12, 4  ;;  %v2149_v15 = vsel %vm667_vm1, %v2141_v12, %v2148_v5  ;;  %v2158_v16 = vrot.slane %v2145_v13, 4  ;;  %v2161_v10 = vsel %vm667_vm1, %v2145_v13, %v2160_v1  ;;  %v3141_v5 = vld [vmem:[%s3415_s15] sm:$0xff]  ;;  %s2658_s15 = scalar_lea.sflag [#allocation5], %s3638_s25 }
 0x766   : > { %v2157_v17 = vperm.slane %v2149_v15, %v3451_v37  ;;  %v2169_v18 = vperm.slane %v2161_v10, %v3451_v37 }
 0x767   : > { %v2147_v19 = vsel %vm667_vm1, %v2146_v14, %v2129_v2  ;;  %v2159_v20 = vsel %vm667_vm1, %v2158_v16, %v2133_v4  ;;  %v3248_v14 = vmov 32.0   ;;  %v3249_v16 = vmov 0  }
 0x768   : > { %v2153_v11 = vperm.slane %v2147_v19, %v3451_v37  ;;  %v2165_v21 = vperm.slane %v2159_v20, %v3451_v37  ;;  %v2172_v22 = vrot.slane %v2157_v17, 4  ;;  %v2176_v6 = vrot.slane %v2169_v18, 4  ;;  %3109 = vset.pattern.permute.xlu0 %v3249_v16 }
 0x769   : > { %3135 = vrcp.f32 %v3248_v14 }
 0x76a   : > { %v2173_v24 = vsel %vm667_vm1, 0.0, %v2172_v22  ;;  %v2170_v25 = vrot.slane %v2153_v11, 4  ;;  %v2174_v8 = vrot.slane %v2165_v21, 4  ;;  %v2177_v26 = vsel %vm667_vm1, 0.0, %v2176_v6 }
 0x76b   : > { %v2178_v27 = vsel %vm667_vm1, %v2172_v22, %v2153_v11  ;;  %v2183_v61 = vrot.slane %v2173_v24, 4  ;;  %v2189_v28 = vsel %vm667_vm1, %v2176_v6, %v2165_v21  ;;  %v2194_v29 = vrot.slane %v2177_v26, 4  ;;  %v2951_v26 = vld [vmem:[%s3896_s11 + $0x18] sm:$0xff] }
 0x76c   : > { %v2171_v31 = vsel %vm667_vm1, 0.0, %v2170_v25  ;;  %v2175_v32 = vsel %vm667_vm1, 0.0, %v2174_v8  ;;  %v2182_v33 = vperm.slane %v2178_v27, %v3441_v23  ;;  %v2193_v34 = vperm.slane %v2189_v28, %v3441_v23  ;;  %v2953_v8 = vld [vmem:[%s3896_s11 + $0x8] sm:$0xff]  ;;  %2402 = vmatpush.bf16.msra.mxu0 %v2951_v26  ;;  %v2950_v28 = vld [vmem:[%s3896_s11 + $0x10] sm:$0xff] }
 0x76d   : > { %v2184_v35 = vsel %vm667_vm1, %v2183_v61, %v2171_v31  ;;  %v2195_v36 = vsel %vm667_vm1, %v2194_v29, %v2175_v32  ;;  %v2955_v27 = vld [vmem:[%s3896_s11 + $0x28] sm:$0xff]  ;;  %2374 = vmatpush.bf16.msra.mxu3 %v2953_v8  ;;  %v2952_v61 = vld [vmem:[%s3896_s11] sm:$0xff] }
 0x76e   : > { %v2188_v38 = vperm.slane %v2184_v35, %v3441_v23  ;;  %v2199_v39 = vperm.slane %v2195_v36, %v3441_v23  ;;  %v2202_v41 = vrot.slane %v2182_v33, 4  ;;  %v2214_v42 = vrot.slane %v2193_v34, 4  ;;  %2444 = vmatpush.bf16.msrb.mxu1 %v2955_v27  ;;  %v2954_v31 = vld [vmem:[%s3896_s11 + $0x20] sm:$0xff] }
 0x76f   : > { %v3136_v10 = vpop.eup %3135 }
 0x770   : > { %v2203_v43 = vsel %vm667_vm1, %v2188_v38, %v2202_v41  ;;  %v2215_v45 = vsel %vm667_vm1, %v2199_v39, %v2214_v42  ;;  %v2200_v46 = vrot.slane %v2188_v38, 4  ;;  %v2212_v47 = vrot.slane %v2199_v39, 4  ;;  %2403 = vmatpush.bf16.msra.mxu0 %v2950_v28 }
 0x771   : > { %v2211_v48 = vperm.slane %v2203_v43, %v3451_v37  ;;  %v2223_v7 = vperm.slane %v2215_v45, %v3451_v37  ;;  %v2293_v17 = vmul.f32 32.0, %v3136_v10  ;;  %2375 = vmatpush.bf16.msra.mxu3 %v2952_v61  ;;  %v2326_v41 = vlaneseq  ;;  %v3113_v43 = vld [vmem:[%s3932_s7] ss:$0 sm:$0xff]  ;;  %s3162_s7 = scalar_lea.hbm %s3904_s19, 64 }
 0x772   : > { %v2201_v49 = vsel %vm667_vm1, %v2200_v46, %v2182_v33  ;;  %v2213_v50 = vsel %vm667_vm1, %v2212_v47, %v2193_v34  ;;  %2445 = vmatpush.bf16.msrb.mxu1 %v2954_v31  ;;  %v3114_v47 = vld [vmem:[%s3933_s8] ss:$0 sm:$0xff] }
 0x773   : > { %v2230_v51 = vrot.slane %v2211_v48, 4  ;;  %v2228_v52 = vrot.slane %v2223_v7, 4  ;;  %v2207_v23 = vperm.slane %v2201_v49, %v3451_v37  ;;  %v2219_v54 = vperm.slane %v2213_v50, %v3451_v37  ;;  %v2949_v37 = vld [vmem:[%s3928_s5 + $0x8] sm:$0xff] }
 0x774   : > { %2279 = vmatpush.bf16.msra.mxu2 %v2949_v37  ;;  %v2294_v18 = vsub.f32 1.0, %v2293_v17  ;;  %v2327_v45 = vshrl.u32 %v2326_v41, 7  ;;  %v2959_v37 = vld [vmem:[%s3898_s13 + $0x38] sm:$0xff] }
 0x775   : > { %v2231_v55 = vsel %vm667_vm1, %v2223_v7, %v2230_v51  ;;  %v2229_v9 = vsel %vm667_vm1, %v2228_v52, %v2211_v48  ;;  %v2224_v56 = vrot.slane %v2219_v54, 4  ;;  %v2226_v57 = vrot.slane %v2207_v23, 4  ;;  %2551 = vmatpush.bf16.msrb.mxu3 %v2959_v37 }
 0x776   : > { %2241 = vrot.lane.b32.xlu1 %v2231_v55, %s3245_s2  ;;  %2237 = vrot.lane.b32.xlu0 %v2229_v9, %s3246_s1  ;;  %s3931_s1 = sld [smem:[#allocation12_spill]]  ;;  %v2295_v19 = vmul.f32 %v3136_v10, %v2294_v18  ;;  %v2341_v49 = vadd.s32 4294967295, %v2327_v45  ;;  %v2410_v50 = vadd.s32 1, %v2327_v45 }
 0x777   : > { %v2227_v58 = vsel %vm667_vm1, %v2219_v54, %v2226_v57  ;;  %v2225_v59 = vsel %vm667_vm1, %v2224_v56, %v2207_v23  ;;  %vm2297_vm1 = vweird.f32 %v3136_v10 }
 0x778   : > { %2233 = vrot.lane.b32.xlu2 %v2227_v58, %s3247_s3  ;;  %2280 = vmatpush.bf16.msra.mxu2 %v2948_v60  ;;  %v2296_v20 = vadd.f32 %v3136_v10, %v2295_v19  ;;  %vm2342_vm12 = vcmp.ge.s32.totalorder %v2341_v49, 0  ;;  %vm2412_vm13 = vcmp.lt.s32.totalorder %v2410_v50, 8  ;;  %v2963_v60 = vld [vmem:[%s3898_s13 + $0x18] sm:$0xff] }
 0x77a   : > { %v3741_v11 = vsel %vm2297_vm1, %v3136_v10, %v2296_v20 }
 0x77c   : > { %s613_s3 = scalar_lea.vmem %s3931_s1, %s3930_s4  ;;  %2511 = vmatpush.bf16.msrb.mxu2 %v2963_v60  ;;  %s2684_s4 = sshll.u32 %s3642_s28, 4  ;;  %s2685_s4 = int_to_ptr.vmem [resolvable:$true] %s2684_s4 }
 0x77d   : > { %v617_v15 = vld [vmem:[%s613_s3] sm:$0xff]  ;;  %s2683_s1 = scalar_lea.hbm %s3904_s19, %s2968_s22 }
 0x77e   : > { %2330 = vperm.xlu0 %3109, %v617_v15   ;;  %v3115_v15 = vld [vmem:[%s3897_s12] ss:$0 sm:$0xff]  ;;  %s2686_s3 = sshll.u32 %s2683_s1, 4  ;;  %s2687_s3 = int_to_ptr.hbm [resolvable:$true] %s2686_s3 }
 0x77f   : > { %s3156_s29 = sshra.s32 %s2687_s3, 4  ;;  %s3157_s29 = int_to_ptr.hbm [resolvable:$true] %s3156_s29 }
 0x780   : > { %s3158_s5 = scalar_lea.hbm %s3157_s29, 16  ;;  %p3163_p0 = scmp.lt.s32.totalorder %s3157_s29, %s3904_s19 }
 0x781   : > { %p3159_p11 = scmp.ne.s32.totalorder %s3157_s29, %s3158_s5  ;;  %p3164_p1 = scmp.lt.s32.totalorder %s3162_s7, %s3158_s5 }
 0x783   : > { %p3160_p12 = pnand %p3159_p11, %p3389_p5  ;;  %p3165_p2 = por %p3164_p1, %p3163_p0 }
 0x785   : > { %p3161_p13 = pneg %p3160_p12 }
 0x787   : > { %p3166_p3 = pnand %p3165_p2, %p3161_p13 }
 0x7d2   : > { %v2234_v40 = vpop.permute.xlu2 %2233 }
 0x7d3   : > { %v2244_v62 = vsel %vm1335_vm3, %v2225_v59, %v2234_v40  ;;  %v2967_v40 = vld [vmem:[%s3898_s13 + $0x58] sm:$0xff] }
 0x7d4   : > { %2603 = vmatpush.bf16.msrb.mxu0 %v2967_v40 }
 0x7e8   : > { %v2242_v63 = vpop.permute.xlu1 %2241  ;;  %v2238_v0 = vpop.permute.xlu0 %2237 }
 0x7e9   : > { %v2246_v2 = vsel %vm2245_vm8, %v2244_v62, %v2238_v0  ;;  %v2958_v62 = vld [vmem:[%s3898_s13 + $0x30] sm:$0xff] }
 0x7ea   : > { %v2248_v4 = vsel %vm2247_vm9, %v2246_v2, %v2242_v63  ;;  %2552 = vmatpush.bf16.msrb.mxu3 %v2958_v62  ;;  %v2962_v63 = vld [vmem:[%s3898_s13 + $0x10] sm:$0xff]  ;;  %v2957_v2 = vld [vmem:[%s3898_s13 + $0x28] sm:$0xff] }
 0x7eb   : > { %v2249_v30 = vpack.c.bf16 %v2248_v4, %v2248_v4  ;;  %v2966_v0 = vld [vmem:[%s3898_s13 + $0x50] sm:$0xff]  ;;  %2512 = vmatpush.bf16.msrb.mxu2 %v2962_v63  ;;  %v2961_v4 = vld [vmem:[%s3898_s13 + $0x8] sm:$0xff] }
 0x7ec   : > { %2604 = vmatpush.bf16.msrb.mxu0 %v2966_v0 }
 0x7ed   : > { %2836 = vmatmul.msk.bf16.vlgmr.msra.gmra.mxu2 %vm639_vm0, %v2249_v30  ;;  %v2965_v30 = vld [vmem:[%s3898_s13 + $0x48] sm:$0xff] }
 0x7ee   : > { %2553 = vmatpush.bf16.msrb.mxu3 %v2957_v2 }
 0x7ef   : > { %2513 = vmatpush.bf16.msrb.mxu2 %v2961_v4 }
 0x7f0   : > { %v2331_v51 = vpop.permute.xlu0 %2330  ;;  %2605 = vmatpush.bf16.msrb.mxu0 %v2965_v30 }
 0x870   : > { %v2282_v53 = vpop.f32.mrf.mxu2 }
 0x871   : > { %v2283_v3 = vadd.f32 %v3112_v44, %v2282_v53  ;;  %v2956_v44 = vld [vmem:[%s3898_s13 + $0x20] sm:$0xff] }
 0x872   : > { %2554 = vmatpush.bf16.msrb.mxu3 %v2956_v44  ;;  %v2960_v53 = vld [vmem:[%s3898_s13] sm:$0xff] }
 0x873   : > { %v2286_v1 = vadd.f32 %v3141_v5, %v2283_v3  ;;  %v2964_v3 = vld [vmem:[%s3898_s13 + $0x40] sm:$0xff]  ;;  %2514 = vmatpush.bf16.msrb.mxu2 %v2960_v53 }
 0x874   : > { %2606 = vmatpush.bf16.msrb.mxu0 %v2964_v3 }
 0x875   : > { %v2289_v12 = vsel %vm639_vm0, %v2286_v1, 0.0 }
 0x876   : > { %2290 = vadd.xlane.f32.xlu1 %v2289_v12 }
 0x878   : > { %v2284_v13 = vpop.f32.mrf.mxu2 }
 0x8e9   : > { %v2291_v21 = vpop.xlane.xlu1 %2290 }
 0x8ea   : > { %v2299_v22 = vmul.f32 %v3741_v11, %v2291_v21 }
 0x8ec   : > { %v2300_v6 = vsub.f32 %v2286_v1, %v2299_v22 }
 0x8ee   : > { %v2301_v24 = vmul.f32 %v2300_v6, %v2300_v6 }
 0x8f0   : > { %v2302_v25 = vsel %vm639_vm0, %v2301_v24, 0.0 }
 0x8f1   : > { %2303 = vadd.xlane.f32.xlu2 %v2302_v25 }
 0x964   : > { %v2304_v29 = vpop.xlane.xlu2 %2303 }
 0x965   : > { %v2305_v32 = vmul.f32 %v2304_v29, %v3741_v11  ;;  %v3116_v29 = vld [vmem:[%s3899_s14] ss:$0 sm:$0xff] }
 0x967   : > { %v2306_v33 = vadd.f32 1e-05, %v2305_v32 }
 0x969   : > { %3137 = vrsqrt.f32 %v2306_v33  ;;  %vm2313_vm10 = vweird.f32 %v2306_v33 }
 0x96f   : > { %v3138_v34 = vpop.eup %3137 }
 0x970   : > { %v2308_v35 = vmul.f32 %v3138_v34, %v2306_v33  ;;  %vm2314_vm3 = vweird.f32 %v3138_v34 }
 0x971   : > { %vm2315_vm11 = vmor %vm2313_vm10, %vm2314_vm3 }
 0x972   : > { %v2309_v36 = vmul.f32 %v3138_v34, %v2308_v35 }
 0x974   : > { %v2310_v38 = vmul.f32 0.5, %v2309_v36 }
 0x976   : > { %v2311_v39 = vsub.f32 1.5, %v2310_v38 }
 0x978   : > { %v2312_v42 = vmul.f32 %v3138_v34, %v2311_v39 }
 0x97a   : > { %v2316_v46 = vsel %vm2315_vm11, %v3138_v34, %v2312_v42 }
 0x97b   : > { %v2317_v48 = vmul.f32 %v2316_v46, %v2300_v6 }
 0x97d   : > { %v2321_v7 = vmul.f32 %v3113_v43, %v2317_v48 }
 0x97f   : > { %v3770_v52 = vadd.f32 %v3114_v47, %v2321_v7 }
 0x981   : > { %v2333_v23 = vmul.f32 %v2331_v51, %v3770_v52 }
 0x983   : > { %v2334_v54 = vpack.c.bf16 %v2333_v23, %v2333_v23  ;;  %v2340_v55 = vrot.slane %v2333_v23, 7  ;;  %v2409_v9 = vrot.slane %v2333_v23, 1 }
 0x985   : > { %v2347_v56 = vsel %vm2342_vm12, %v2340_v55, 0.0  ;;  %v2416_v57 = vsel %vm2412_vm13, %v2409_v9, 0.0  ;;  %2858 = vmatmul.msk.bf16.vlgmr.msra.gmra.mxu0 %vm639_vm0, %v2334_v54 }
 0x986   : > { %v2348_v58 = vpack.c.bf16 %v2347_v56, %v2347_v56  ;;  %v2417_v59 = vpack.c.bf16 %v2416_v57, %v2416_v57 }
 0x988   : > { %2849 = vmatmul.msk.bf16.vlgmr.msra.gmra.mxu3 %vm639_vm0, %v2348_v58  ;;  %2871 = vmatmul.msk.bf16.vlgmr.msrb.gmra.mxu1 %vm639_vm0, %v2417_v59 }
 0xa02   : > { %v2405_v5 = vpop.f32.mrf.mxu0 }
 0xa05   : > { %v2447_v1 = vpop.f32.mrf.mxu1 }
 0xa0a   : > { %v2407_v12 = vpop.f32.mrf.mxu0 }
 0xa0b   : > { %v2377_v13 = vpop.f32.mrf.mxu3 }
 0xa0c   : > { %v2406_v14 = vadd.f32 %v2405_v5, %v2377_v13 }
 0xa0d   : > { %v2449_v16 = vpop.f32.mrf.mxu1 }
 0xa0e   : > { %v2451_v10 = vadd.f32 %v2447_v1, %v2406_v14 }
 0xa10   : > { %v2456_v17 = vadd.f32 %v3115_v15, %v2451_v10 }
 0xa12   : > { %v2457_v18 = vmax.f32 %v2456_v17, 0.0 }
 0xa13   : > { %v2379_v19 = vpop.f32.mrf.mxu3 }
 0xa14   : > { %v2458_v20 = vpack.c.bf16 %v2457_v18, %v2457_v18  ;;  %v2468_v21 = vrot.slane %v2457_v18, 7  ;;  %v2560_v22 = vrot.slane %v2457_v18, 1 }
 0xa16   : > { %v2469_v6 = vsel %vm2342_vm12, %v2468_v21, 0.0  ;;  %v2561_v24 = vsel %vm2412_vm13, %v2560_v22, 0.0  ;;  %2913 = vmatmul.msk.bf16.vlgmr.msrb.gmra.mxu3 %vm2503_vm14, %v2458_v20 }
 0xa17   : > { %v2470_v25 = vpack.c.bf16 %v2469_v6, %v2469_v6  ;;  %v2562_v8 = vpack.c.bf16 %v2561_v24, %v2561_v24 }
 0xa19   : > { %2896 = vmatmul.msk.bf16.vlgmr.msrb.gmra.mxu2 %vm2503_vm14, %v2470_v25  ;;  %2938 = vmatmul.msk.bf16.vlgmr.msrb.gmra.mxu0 %vm2503_vm14, %v2562_v8 }
 0xa96   : > { %v2608_v26 = vpop.f32.mrf.mxu0 }
 0xa99   : > { %v2556_v27 = vpop.f32.mrf.mxu3 }
 0xa9c   : > { %v2516_v61 = vpop.f32.mrf.mxu2 }
 0xa9d   : > { %v2557_v28 = vadd.f32 %v2556_v27, %v2516_v61 }
 0xa9e   : > { %v2610_v31 = vpop.f32.mrf.mxu0 }
 0xa9f   : > { %v2612_v32 = vadd.f32 %v2608_v26, %v2557_v28 }
 0xaa1   : > { %v2558_v33 = vpop.f32.mrf.mxu3  ;;  %v2617_v34 = vadd.f32 %v3116_v29, %v2612_v32 }
 0xaa3   : > { %v2618_v35 = vadd.f32 %v2617_v34, %v3770_v52 }
 0xaa4   : > { %v2518_v36 = vpop.f32.mrf.mxu2 }
 0xaa5   : > { %v2621_v38 = vsel %vm639_vm0, %v2618_v35, 0.0 }
 0xaa6   : > { %2622 = vadd.xlane.f32.xlu0 %v2621_v38 }
 0xb19   : > { %v2623_v39 = vpop.xlane.xlu0 %2622 }
 0xb1a   : > { %v2624_v41 = vmul.f32 %v2623_v39, %v3741_v11 }
 0xb1c   : > { %v2625_v42 = vsub.f32 %v2618_v35, %v2624_v41 }
 0xb1e   : > { %v2626_v43 = vmul.f32 %v2625_v42, %v2625_v42 }
 0xb20   : > { %v2627_v45 = vsel %vm639_vm0, %v2626_v43, 0.0 }
 0xb21   : > { %2628 = vadd.xlane.f32.xlu1 %v2627_v45 }
 0xb22   : > { %3169 = shalt.err (!%p3166_p3)
}
 0xb23   : > { %s3250_s22 = smov 4   ;;  %s3934_s26 = smov 64   ;;  %v3117_v54 = vld [vmem:[%s3894_s9] ss:$0 sm:$0xff] }
 0xb24   : > { %2970 = dma.vmem_to_hbm [thread:$0]  (%p3389_p5), %s2685_s4, 256, %s2687_s3, %s2658_s15, %s3934_s26, %s3934_s26, %s3250_s22  }
 0xb25   : > { %s2807_s6 = sshll.u32 %s3638_s25, 3  ;;  %s2941_s7 = sshll.u32 %s3372_s17, 3  ;;  %v3118_v9 = vld [vmem:[%s3895_s10] ss:$0 sm:$0xff] }
 0xb26   : > { %s2668_s3 = scalar_lea.hbm %s3903_s18, %s2941_s7  ;;  %s595_s17 = scalar_lea.vmem [#allocation2], %s2807_s6 }
 0xb27   : > { %s2670_s5 = sshll.u32 %s595_s17, 4  ;;  %s2672_s20 = sshll.u32 %s2668_s3, 4  ;;  %s2671_s5 = int_to_ptr.vmem [resolvable:$true] %s2670_s5  ;;  %s2673_s20 = int_to_ptr.hbm [resolvable:$true] %s2672_s20 }
 0xb28   : > { %s2653_s28 = scalar_lea.sflag [#allocation3], %s3638_s25  ;;  %s3184_s22 = sshra.s32 %s2673_s20, 4  ;;  %s3185_s22 = int_to_ptr.hbm [resolvable:$true] %s3184_s22 }
 0xb29   : > { %s3186_s26 = scalar_lea.hbm %s3185_s22, 8  ;;  %s3190_s6 = scalar_lea.hbm %s3903_s18, 16 }
 0xb2a   : > { %p3187_p4 = scmp.ne.s32.totalorder %s3185_s22, %s3186_s26  ;;  %p3191_p9 = scmp.lt.s32.totalorder %s3185_s22, %s3903_s18 }
 0xb2b   : > { %p3192_p10 = scmp.lt.s32.totalorder %s3190_s6, %s3186_s26 }
 0xb2c   : > { %p3188_p7 = pnand %p3187_p4, %p3389_p5 }
 0xb2d   : > { %p3193_p11 = por %p3192_p10, %p3191_p9 }
 0xb2e   : > { %p3189_p8 = pneg %p3188_p7 }
 0xb30   : > { %p3194_p12 = pnand %p3193_p11, %p3189_p8 }
 0xb94   : > { %v2629_v46 = vpop.xlane.xlu1 %2628 }
 0xb95   : > { %v2630_v47 = vmul.f32 %v2629_v46, %v3741_v11 }
 0xb97   : > { %v2631_v48 = vadd.f32 1e-05, %v2630_v47 }
 0xb99   : > { %3139 = vrsqrt.f32 %v2631_v48  ;;  %vm2638_vm2 = vweird.f32 %v2631_v48 }
 0xb9f   : > { %v3140_v7 = vpop.eup %3139 }
 0xba0   : > { %v2633_v49 = vmul.f32 %v3140_v7, %v2631_v48  ;;  %vm2639_vm15 = vweird.f32 %v3140_v7 }
 0xba1   : > { %vm2640_vm4 = vmor %vm2638_vm2, %vm2639_vm15 }
 0xba2   : > { %v2634_v50 = vmul.f32 %v3140_v7, %v2633_v49 }
 0xba4   : > { %v2635_v51 = vmul.f32 0.5, %v2634_v50 }
 0xba6   : > { %v2636_v52 = vsub.f32 1.5, %v2635_v51 }
 0xba8   : > { %v2637_v23 = vmul.f32 %v3140_v7, %v2636_v52 }
 0xbaa   : > { %v2641_v11 = vsel %vm2640_vm4, %v3140_v7, %v2637_v23 }
 0xbab   : > { %v2642_v55 = vmul.f32 %v2641_v11, %v2625_v42 }
 0xbad   : > { %v2646_v56 = vmul.f32 %v3117_v54, %v2642_v55 }
 0xbaf   : > { %v2650_v57 = vadd.f32 %v3118_v9, %v2646_v56 }
 0xbb1   : > { %2651 = vst.msk [vmem:[%s595_s17] sm:$0xff] %vm639_vm0, %v2650_v57 }
 0xbb2   : > { %3197 = shalt.err (!%p3194_p12)
}
 0xbb3   : > { %2969 = dma.vmem_to_hbm [thread:$0]  (%p3389_p5), %s2671_s5, 128, %s2673_s20, %s2653_s28  }
 0xbb4 PF: > { %p2980_p13 = scmp.ge.s32.totalorder %s3236_s16, 2  ;;  %s2701_s25 = sand.u32 1, %s3224_s0  }
 0xbb5   : > { %s2702_s1 = scalar_lea.sflag [#allocation3], %s2701_s25 }
 0xbb6   : > { %p2974_p0 = pnand %p2980_p13, %p3393_p6 }
 0xbb8   : > { %p2975_p1 = pneg %p2974_p0 }
 0xbba   : > { %3215 = dma.done.wait (%p2975_p1), %s2702_s1, 128  }
 0xbbb   : > { %3217 = vsyncadd (%p2975_p1), %s2702_s1, 4294967168  ;;  %s2712_s3 = scalar_lea.sflag [#allocation5], %s2701_s25 }
 0xbbc   : > { %3219 = dma.done.wait (%p2975_p1), %s2712_s3, 256  }
 0xbbd   : > { %3221 = vsyncadd (%p2975_p1), %s2712_s3, 4294967040  ;;  %s3935_s15 = sld [smem:[#allocation8_spill]]  ;;  %p33_p5 = scmp.ge.s32.totalorder %s3376_s21, 4  }
 0xbbe   : > { %s3936_s23 = sld [smem:[#allocation9_spill]]  ;;  %s3937_s0 = smov %s3228_s30 }
 0xbbf   : > { %s3940_s16 = smov %s3376_s21 }
 0xbc0   :  { %35 = sbr.rel (!%p33_p5) target bundleno = 15 (0xf), region = 150 }
 0xbc3   : > { %s3938_s30 = smov %s3935_s15 }
 0xbc4   : > { %s3939_s15 = smov %s3936_s23 }
 0xbc5   :  { %2718 = vsyncpa [#allocation3], 1 }
 0xbc6   :  { %2720 = vsyncpa [#allocation3 + $0x1], 1 }
 0xbc7   :  { %2721 = vsyncpa [#allocation5], 1 }
 0xbc8   :  { %2723 = vsyncpa [#allocation5 + $0x1], 1 }

</bundles_post_ra>
